<compile_context>
chip_gen: v6e
topology: v6e:2x2x1
jax: 0.10.0
libtpu: 0.0.40
codegen_flags: <defaults>
</compile_context>

<pallas_src>
import functools
import math

import jax
import jax.numpy as jnp
import numpy as np
from jax import lax
from jax.experimental import pallas as pl
from jax.experimental.pallas import tpu as pltpu

_MASK_VALUE = -1e6                              # matches torch sequence_mask / top-k fill
_REMOVED = float(np.finfo(np.float32).min)      # sentinel for "already taken" in top-k


def _mhsa_kernel(valid_lens_ref,                   # SMEM (B,) int32, scalar-prefetch
                 q_ref, k_ref, v_ref,              # (Bb,Tq,Dq) (Bb,Tk,Dk) (Bb,Tk,Dv)
                 wq_ref, wk_ref, wv_ref, wo_ref,   # (Dq,H) (Dk,H) (Dv,H) (H,H)
                 out_ref,                          # (Bb, Tq, H)
                 *, num_heads, topk, batch_block, score_dtype, mxu_dtype):
    g = pl.program_id(0)
    Bb = batch_block
    nh = num_heads
    Tq = q_ref.shape[1]
    Tk = k_ref.shape[1]
    H = wq_ref.shape[1]
    d = H // nh
    BH = Bb * nh

    # ---- projections: one (Bb*T, D) @ (D, H) MXU matmul each --------------------
    # Leading-dim collapse is layout-free (Tq/Tk multiples of the sublane tile).
    q2 = q_ref[...].reshape(Bb * Tq, q_ref.shape[2])
    k2 = k_ref[...].reshape(Bb * Tk, k_ref.shape[2])
    v2 = v_ref[...].reshape(Bb * Tk, v_ref.shape[2])

    # Fold 1/sqrt(d) into Q once (instead of scaling every (Tq,Tk) score tile).
    scale = 1.0 / math.sqrt(d)
    Q = (jnp.dot(q2.astype(score_dtype), wq_ref[...],
                 preferred_element_type=jnp.float32) * scale).astype(score_dtype)
    K = jnp.dot(k2.astype(score_dtype), wk_ref[...],
                preferred_element_type=jnp.float32).astype(score_dtype)
    V = jnp.dot(v2.astype(mxu_dtype), wv_ref[...],
                preferred_element_type=jnp.float32).astype(mxu_dtype)

    # ---- head split: (Bb*T, H) -> (Bb*nh, T, d), batch-major / head-minor -------
    # nh lane slices + one stack; the (Bb, nh) collapse is a free leading reshape.
    # TODO(synk): for production choose/pad d to a multiple of 128 so these lane
    # slices are tile-aligned and the MXU contraction depth is native.
    def split_heads(X, T):
        X3 = X.reshape(Bb, T, H)
        Xh = jnp.stack([X3[:, :, h * d:(h + 1) * d] for h in range(nh)], axis=1)
        return Xh.reshape(BH, T, d)

    Qh = split_heads(Q, Tq)
    Kh = split_heads(K, Tk)
    Vh = split_heads(V, Tk)

    # ---- scores for all heads/batches in one batched MXU contraction -----------
    S = jnp.einsum('bqd,bkd->bqk', Qh, Kh,
                   preferred_element_type=jnp.float32)               # (BH, Tq, Tk) f32

    # ---- valid-length mask: integer compare, no materialized float mask --------
    col = lax.broadcasted_iota(jnp.int32, (BH, Tq, Tk), 2)
    vl_bound = valid_lens_ref[g * Bb]                                # scalar int32
    if Bb > 1:
        slab = lax.broadcasted_iota(jnp.int32, (BH, Tq, Tk), 0)      # leading index
        for b in range(1, Bb):
            vl_bound = jnp.where(slab >= b * nh,
                                 valid_lens_ref[g * Bb + b], vl_bound)
    S = jnp.where(col < vl_bound, S, _MASK_VALUE)

    # ---- top-k sparsification: keep scores >= k-th largest of each query row ---
    # Exact torch.topk duplicate-counting semantics: repeatedly take the row max,
    # knock out ALL of its occurrences, and track the cumulative multiplicity;
    # the k-th largest value is the first distinct maximum whose cumulative
    # multiplicity reaches k.  (One max reduce + one count reduce per iteration;
    # no position iota / sentinel temporaries.)
    k_eff = min(topk, Tk)
    work = S
    threshs = []
    cums = []
    cum = jnp.zeros((BH, Tq, 1), jnp.float32)
    for i in range(k_eff):
        m = jnp.max(work, axis=-1, keepdims=True)                    # (BH, Tq, 1)
        threshs.append(m)
        if i + 1 < k_eff:
            hit = work == m
            cum = cum + jnp.sum(hit.astype(jnp.float32), axis=-1, keepdims=True)
            cums.append(cum)
            work = jnp.where(hit, _REMOVED, work)
    thresh = threshs[-1]
    for i in range(k_eff - 2, -1, -1):
        thresh = jnp.where(cums[i] >= float(k_eff), threshs[i], thresh)
    S = jnp.where(S < thresh, _MASK_VALUE, S)

    # ---- one stacked masked softmax over all heads/batches ---------------------
    # The row max is threshs[0] (top-1 is never masked) -> no extra max reduce.
    p = jnp.exp(S - threshs[0])
    denom = jnp.sum(p, axis=-1, keepdims=True)
    attn = p * pl.reciprocal(denom, approx=True)                     # EUP vrcp

    # ---- context for all heads/batches in one batched MXU contraction ----------
    ctx = jnp.einsum('bqk,bkd->bqd', attn.astype(mxu_dtype), Vh,
                     preferred_element_type=jnp.float32).astype(mxu_dtype)

    # ---- merge heads back to (Bb*Tq, H); single (M,H)@(H,H) output projection --
    ctx4 = ctx.reshape(Bb, nh, Tq, d)
    merged = jnp.concatenate([ctx4[:, h] for h in range(nh)], axis=-1)  # (Bb,Tq,H)
    y = jnp.dot(merged.reshape(Bb * Tq, H), wo_ref[...],
                preferred_element_type=jnp.float32)
    out_ref[...] = y.reshape(Bb, Tq, H).astype(out_ref.dtype)


def multi_head_sparse_attention(queries, keys, values, valid_lens,
                                wq, wk, wv, wo, *, num_heads, k,
                                batch_block=None,
                                score_mxu_dtype=jnp.float32,
                                mxu_dtype=jnp.bfloat16):
    B, Tq, Dq = queries.shape
    _, Tk, Dk = keys.shape
    _, _, Dv = values.shape
    H = wq.shape[1]
    assert H % num_heads == 0
    assert k >= 1

    if batch_block is None:
        # Pick Bb = batch elements per grid step such that:
        #   (a) grid length G = B/Bb stays >= 2 when B allows it (keeps both
        #       v7x TensorCores busy under the "parallel" grid axis),
        #   (b) the flattened projection M-dim Bb*max(Tq,Tk) stays <= 256
        #       (v6e/v7x MXU width; v5e simply runs two 128-row passes),
        #   (c) the per-step score panel + temporaries fit a conservative VMEM
        #       budget (matters most on v7x's 64 MiB VMEM).
        batch_block = 1
        score_budget = 8 * 1024 * 1024
        for cand in range(1, B + 1):
            if B % cand != 0:
                continue
            if B >= 2 and B // cand < 2:
                continue
            if cand * max(Tq, Tk) > 256:
                continue
            if 6 * cand * num_heads * Tq * Tk * 4 > score_budget:
                continue
            batch_block = cand
    Bb = batch_block
    assert B % Bb == 0
    G = B // Bb

    # Weight dtypes: Q/K path keeps score_mxu_dtype (f32 default -> exact top-k
    # parity with the f32 reference); V / output path runs bf16 on the MXU.
    wq_c = wq.astype(score_mxu_dtype)
    wk_c = wk.astype(score_mxu_dtype)
    wv_c = wv.astype(mxu_dtype)
    wo_c = wo.astype(mxu_dtype)

    def _nbytes(shape, dt):
        return int(np.prod(shape)) * jnp.dtype(dt).itemsize

    # Rough per-step VMEM footprint -> scoped VMEM limit (never below the
    # default 32 MiB, capped at 64 MiB so it is valid on every generation).
    score_bytes = Bb * num_heads * Tq * Tk * 4
    act_bytes = (Bb * Tq * H + 2 * Bb * Tk * H) * 4
    tile_bytes = 2 * (_nbytes((Bb, Tq, Dq), queries.dtype)
                      + _nbytes((Bb, Tk, Dk), keys.dtype)
                      + _nbytes((Bb, Tk, Dv), values.dtype)
                      + _nbytes((Bb, Tq, H), jnp.float32))
    weight_bytes = 2 * (_nbytes(wq_c.shape, wq_c.dtype) + _nbytes(wk_c.shape, wk_c.dtype)
                        + _nbytes(wv_c.shape, wv_c.dtype) + _nbytes(wo_c.shape, wo_c.dtype))
    est = tile_bytes + weight_bytes + 8 * score_bytes + 4 * act_bytes
    vmem_limit = int(min(64 * 1024 * 1024, max(32 * 1024 * 1024, 2 * est)))

    kernel = functools.partial(_mhsa_kernel, num_heads=num_heads, topk=k,
                               batch_block=Bb, score_dtype=score_mxu_dtype,
                               mxu_dtype=mxu_dtype)

    grid_spec = pltpu.PrefetchScalarGridSpec(
        num_scalar_prefetch=1,
        grid=(G,),
        in_specs=[
            pl.BlockSpec((Bb, Tq, Dq), lambda g, vl: (g, 0, 0)),
            pl.BlockSpec((Bb, Tk, Dk), lambda g, vl: (g, 0, 0)),
            pl.BlockSpec((Bb, Tk, Dv), lambda g, vl: (g, 0, 0)),
            # Grid-invariant weights (constant index_map -> fetched once).
            pl.BlockSpec((Dq, H), lambda g, vl: (0, 0)),
            pl.BlockSpec((Dk, H), lambda g, vl: (0, 0)),
            pl.BlockSpec((Dv, H), lambda g, vl: (0, 0)),
            pl.BlockSpec((H, H), lambda g, vl: (0, 0)),
        ],
        out_specs=pl.BlockSpec((Bb, Tq, H), lambda g, vl: (g, 0, 0)),
    )

    return pl.pallas_call(
        kernel,
        out_shape=jax.ShapeDtypeStruct((B, Tq, H), jnp.float32),
        grid_spec=grid_spec,
        compiler_params=pltpu.CompilerParams(
            dimension_semantics=("parallel",),
            vmem_limit_bytes=vmem_limit),
    )(valid_lens.astype(jnp.int32), queries, keys, values,
      wq_c, wk_c, wv_c, wo_c)


def multi_head_sparse_attention_reference(queries, keys, values, valid_lens,
                                          wq, wk, wv, wo, *, num_heads, k):
    """Pure-JAX mirror of the torch MultiHeadSparseAttention forward (f32)."""
    Q = queries @ wq
    K = keys @ wk
    V = values @ wv
    B, Tq, H = Q.shape
    Tk = K.shape[1]
    d = H // num_heads

    def split(x):
        b, t, _ = x.shape
        x = x.reshape(b, t, num_heads, d).transpose(0, 2, 1, 3)
        return x.reshape(b * num_heads, t, d)

    Qh, Kh, Vh = split(Q), split(K), split(V)
    scores = jnp.einsum('bqd,bkd->bqk', Qh, Kh) / math.sqrt(d)
    vl = jnp.repeat(valid_lens, num_heads)                          # (B*nh,)
    col = jnp.arange(Tk)
    mask = col[None, None, :] < vl[:, None, None]
    scores = jnp.where(mask, scores, -1e6)
    kth = jax.lax.top_k(scores, min(k, Tk))[0][..., -1:]            # (B*nh, Tq, 1)
    scores = jnp.where(scores < kth, -1e6, scores)
    attn = jax.nn.softmax(scores, axis=-1)
    out = jnp.einsum('bqk,bkd->bqd', attn, Vh)
    out = out.reshape(B, num_heads, Tq, d).transpose(0, 2, 1, 3).reshape(B, Tq, H)
    return out @ wo


if __name__ == "__main__":
    # Small shapes consistent with the torch module's constructor.
    query_size, key_size, value_size = 16, 32, 24
    num_hiddens, num_heads, topk = 32, 4, 4
    B, Tq, Tk = 2, 8, 16

    key = jax.random.PRNGKey(0)
    ks = jax.random.split(key, 7)

    queries = jax.random.normal(ks[0], (B, Tq, query_size), jnp.float32)
    keys_in = jax.random.normal(ks[1], (B, Tk, key_size), jnp.float32)
    values_in = jax.random.normal(ks[2], (B, Tk, value_size), jnp.float32)
    valid_lens = jnp.array([5, 12], dtype=jnp.int32)

    def init_linear(kk, fan_in, fan_out):
        bound = 1.0 / math.sqrt(fan_in)
        return jax.random.uniform(kk, (fan_in, fan_out), jnp.float32, -bound, bound)

    wq = init_linear(ks[3], query_size, num_hiddens)
    wk = init_linear(ks[4], key_size, num_hiddens)
    wv = init_linear(ks[5], value_size, num_hiddens)
    wo = init_linear(ks[6], num_hiddens, num_hiddens)

    out = multi_head_sparse_attention(queries, keys_in, values_in, valid_lens,
                                      wq, wk, wv, wo,
                                      num_heads=num_heads, k=topk)
    out = jax.block_until_ready(out)

    ref = multi_head_sparse_attention_reference(queries, keys_in, values_in,
                                                valid_lens, wq, wk, wv, wo,
                                                num_heads=num_heads, k=topk)
    # Kernel uses bf16 MXU inputs on the V / attn@V / W_o path (f32 accumulate)
    # and the approximate EUP reciprocal in the softmax; the Q/K/top-k path is
    # exact f32, so compare with a modest, structure-catching tolerance.
    np.testing.assert_allclose(np.asarray(out), np.asarray(ref),
                               rtol=3e-2, atol=3e-2)
    print("KERNEL_OK")
</pallas_src>

<mosaic_0001>
module attributes {stable_mosaic.version = 11 : i64} {
  func.func @_mhsa_kernel(%arg0: i32, %arg1: memref<2xi32, #tpu.memory_space<smem>>, %arg2: memref<1x8x16xf32, #tpu.memory_space<vmem>>, %arg3: memref<1x16x32xf32, #tpu.memory_space<vmem>>, %arg4: memref<1x16x24xf32, #tpu.memory_space<vmem>>, %arg5: memref<16x32xf32, #tpu.memory_space<vmem>>, %arg6: memref<32x32xf32, #tpu.memory_space<vmem>>, %arg7: memref<24x32xbf16, #tpu.memory_space<vmem>>, %arg8: memref<32x32xbf16, #tpu.memory_space<vmem>>, %arg9: memref<1x8x32xf32, #tpu.memory_space<vmem>>) attributes {dimension_semantics = [#tpu.dimension_semantics<parallel>], iteration_bounds = array<i64: 2>, scalar_prefetch = 1 : i64, scratch_operands = 0 : i64, tpu.core_type = #tpu.core_type<tc>, window_params = [{transform_indices = @transform_0, window_bounds = array<i64: 1, 8, 16>}, {transform_indices = @transform_1, window_bounds = array<i64: 1, 16, 32>}, {transform_indices = @transform_2, window_bounds = array<i64: 1, 16, 24>}, {pipeline_mode = #tpu.pipeline_mode<synchronous>, transform_indices = @transform_3, window_bounds = array<i64: 16, 32>}, {pipeline_mode = #tpu.pipeline_mode<synchronous>, transform_indices = @transform_4, window_bounds = array<i64: 32, 32>}, {pipeline_mode = #tpu.pipeline_mode<synchronous>, transform_indices = @transform_5, window_bounds = array<i64: 24, 32>}, {pipeline_mode = #tpu.pipeline_mode<synchronous>, transform_indices = @transform_6, window_bounds = array<i64: 32, 32>}, {transform_indices = @transform_7, window_bounds = array<i64: 1, 8, 32>}]} {
    %c0 = arith.constant 0 : index
    %c0_0 = arith.constant 0 : index
    %c0_1 = arith.constant 0 : index
    %0 = vector.load %arg2[%c0, %c0_0, %c0_1] : memref<1x8x16xf32, #tpu.memory_space<vmem>>, vector<1x8x16xf32>
    %1 = vector.shape_cast %0 : vector<1x8x16xf32> to vector<8x16xf32>
    %c0_2 = arith.constant 0 : index
    %c0_3 = arith.constant 0 : index
    %c0_4 = arith.constant 0 : index
    %2 = vector.load %arg3[%c0_2, %c0_3, %c0_4] : memref<1x16x32xf32, #tpu.memory_space<vmem>>, vector<1x16x32xf32>
    %3 = vector.shape_cast %2 : vector<1x16x32xf32> to vector<16x32xf32>
    %c0_5 = arith.constant 0 : index
    %c0_6 = arith.constant 0 : index
    %c0_7 = arith.constant 0 : index
    %4 = vector.load %arg4[%c0_5, %c0_6, %c0_7] : memref<1x16x24xf32, #tpu.memory_space<vmem>>, vector<1x16x24xf32>
    %5 = vector.shape_cast %4 : vector<1x16x24xf32> to vector<16x24xf32>
    %c0_8 = arith.constant 0 : index
    %c0_9 = arith.constant 0 : index
    %6 = vector.load %arg5[%c0_8, %c0_9] : memref<16x32xf32, #tpu.memory_space<vmem>>, vector<16x32xf32>
    %cst = arith.constant dense<0.000000e+00> : vector<8x32xf32>
    %7 = tpu.matmul %1, %6, %cst {dimension_numbers = #tpu.dot_dimension_numbers<[1], [0], [0], [1], [0, 0, 1, 1], [], []>} : vector<8x16xf32>, vector<16x32xf32>, vector<8x32xf32> -> vector<8x32xf32>
    %cst_10 = arith.constant 0.353553385 : f32
    %8 = vector.broadcast %cst_10 : f32 to vector<8x32xf32>
    %9 = arith.mulf %7, %8 : vector<8x32xf32>
    %c0_11 = arith.constant 0 : index
    %c0_12 = arith.constant 0 : index
    %10 = vector.load %arg6[%c0_11, %c0_12] : memref<32x32xf32, #tpu.memory_space<vmem>>, vector<32x32xf32>
    %cst_13 = arith.constant dense<0.000000e+00> : vector<16x32xf32>
    %11 = tpu.matmul %3, %10, %cst_13 {dimension_numbers = #tpu.dot_dimension_numbers<[1], [0], [0], [1], [0, 0, 1, 1], [], []>} : vector<16x32xf32>, vector<32x32xf32>, vector<16x32xf32> -> vector<16x32xf32>
    %12 = arith.truncf %5 : vector<16x24xf32> to vector<16x24xbf16>
    %c0_14 = arith.constant 0 : index
    %c0_15 = arith.constant 0 : index
    %13 = vector.load %arg7[%c0_14, %c0_15] : memref<24x32xbf16, #tpu.memory_space<vmem>>, vector<24x32xbf16>
    %cst_16 = arith.constant dense<0.000000e+00> : vector<16x32xf32>
    %14 = tpu.matmul %12, %13, %cst_16 {dimension_numbers = #tpu.dot_dimension_numbers<[1], [0], [0], [1], [0, 0, 1, 1], [], []>} : vector<16x24xbf16>, vector<24x32xbf16>, vector<16x32xf32> -> vector<16x32xf32>
    %15 = arith.truncf %14 : vector<16x32xf32> to vector<16x32xbf16>
    %16 = vector.shape_cast %9 : vector<8x32xf32> to vector<1x8x32xf32>
    %17 = vector.extract_strided_slice %16 {offsets = [0, 0, 0], sizes = [1, 8, 8], strides = [1, 1, 1]} : vector<1x8x32xf32> to vector<1x8x8xf32>
    %18 = vector.extract_strided_slice %16 {offsets = [0, 0, 8], sizes = [1, 8, 8], strides = [1, 1, 1]} : vector<1x8x32xf32> to vector<1x8x8xf32>
    %19 = vector.extract_strided_slice %16 {offsets = [0, 0, 16], sizes = [1, 8, 8], strides = [1, 1, 1]} : vector<1x8x32xf32> to vector<1x8x8xf32>
    %20 = vector.extract_strided_slice %16 {offsets = [0, 0, 24], sizes = [1, 8, 8], strides = [1, 1, 1]} : vector<1x8x32xf32> to vector<1x8x8xf32>
    %21 = vector.shape_cast %17 : vector<1x8x8xf32> to vector<1x1x8x8xf32>
    %22 = vector.shape_cast %18 : vector<1x8x8xf32> to vector<1x1x8x8xf32>
    %23 = vector.shape_cast %19 : vector<1x8x8xf32> to vector<1x1x8x8xf32>
    %24 = vector.shape_cast %20 : vector<1x8x8xf32> to vector<1x1x8x8xf32>
    %25 = tpu.concatenate %21, %22, %23, %24 in 1 : vector<1x1x8x8xf32>, vector<1x1x8x8xf32>, vector<1x1x8x8xf32>, vector<1x1x8x8xf32> -> vector<1x4x8x8xf32>
    %26 = vector.shape_cast %25 : vector<1x4x8x8xf32> to vector<4x8x8xf32>
    %27 = vector.shape_cast %11 : vector<16x32xf32> to vector<1x16x32xf32>
    %28 = vector.extract_strided_slice %27 {offsets = [0, 0, 0], sizes = [1, 16, 8], strides = [1, 1, 1]} : vector<1x16x32xf32> to vector<1x16x8xf32>
    %29 = vector.extract_strided_slice %27 {offsets = [0, 0, 8], sizes = [1, 16, 8], strides = [1, 1, 1]} : vector<1x16x32xf32> to vector<1x16x8xf32>
    %30 = vector.extract_strided_slice %27 {offsets = [0, 0, 16], sizes = [1, 16, 8], strides = [1, 1, 1]} : vector<1x16x32xf32> to vector<1x16x8xf32>
    %31 = vector.extract_strided_slice %27 {offsets = [0, 0, 24], sizes = [1, 16, 8], strides = [1, 1, 1]} : vector<1x16x32xf32> to vector<1x16x8xf32>
    %32 = vector.shape_cast %28 : vector<1x16x8xf32> to vector<1x1x16x8xf32>
    %33 = vector.shape_cast %29 : vector<1x16x8xf32> to vector<1x1x16x8xf32>
    %34 = vector.shape_cast %30 : vector<1x16x8xf32> to vector<1x1x16x8xf32>
    %35 = vector.shape_cast %31 : vector<1x16x8xf32> to vector<1x1x16x8xf32>
    %36 = tpu.concatenate %32, %33, %34, %35 in 1 : vector<1x1x16x8xf32>, vector<1x1x16x8xf32>, vector<1x1x16x8xf32>, vector<1x1x16x8xf32> -> vector<1x4x16x8xf32>
    %37 = vector.shape_cast %36 : vector<1x4x16x8xf32> to vector<4x16x8xf32>
    %38 = vector.shape_cast %15 : vector<16x32xbf16> to vector<1x16x32xbf16>
    %39 = vector.extract_strided_slice %38 {offsets = [0, 0, 0], sizes = [1, 16, 8], strides = [1, 1, 1]} : vector<1x16x32xbf16> to vector<1x16x8xbf16>
    %40 = vector.extract_strided_slice %38 {offsets = [0, 0, 8], sizes = [1, 16, 8], strides = [1, 1, 1]} : vector<1x16x32xbf16> to vector<1x16x8xbf16>
    %41 = vector.extract_strided_slice %38 {offsets = [0, 0, 16], sizes = [1, 16, 8], strides = [1, 1, 1]} : vector<1x16x32xbf16> to vector<1x16x8xbf16>
    %42 = vector.extract_strided_slice %38 {offsets = [0, 0, 24], sizes = [1, 16, 8], strides = [1, 1, 1]} : vector<1x16x32xbf16> to vector<1x16x8xbf16>
    %43 = vector.shape_cast %39 : vector<1x16x8xbf16> to vector<1x1x16x8xbf16>
    %44 = vector.shape_cast %40 : vector<1x16x8xbf16> to vector<1x1x16x8xbf16>
    %45 = vector.shape_cast %41 : vector<1x16x8xbf16> to vector<1x1x16x8xbf16>
    %46 = vector.shape_cast %42 : vector<1x16x8xbf16> to vector<1x1x16x8xbf16>
    %47 = tpu.concatenate %43, %44, %45, %46 in 1 : vector<1x1x16x8xbf16>, vector<1x1x16x8xbf16>, vector<1x1x16x8xbf16>, vector<1x1x16x8xbf16> -> vector<1x4x16x8xbf16>
    %48 = vector.shape_cast %47 : vector<1x4x16x8xbf16> to vector<4x16x8xbf16>
    "tpu.trace_start"() <{level = 10 : i32, message = "bqd,bkd->bqk"}> : () -> ()
    %cst_17 = arith.constant dense<0.000000e+00> : vector<4x8x16xf32>
    %49 = tpu.matmul %26, %37, %cst_17 {dimension_numbers = #tpu.dot_dimension_numbers<[2], [2], [1], [1], [0, 0, 0, 1, 1, 1], [0], [0]>} : vector<4x8x8xf32>, vector<4x16x8xf32>, vector<4x8x16xf32> -> vector<4x8x16xf32>
    "tpu.trace_stop"() : () -> ()
    %50 = tpu.iota {dimensions = array<i32: 2>} : vector<4x8x16xi32>
    %c1_i32 = arith.constant 1 : i32
    %51 = arith.muli %arg0, %c1_i32 : i32
    %52 = arith.index_cast %51 : i32 to index
    %53 = memref.load %arg1[%52] : memref<2xi32, #tpu.memory_space<smem>>
    %54 = vector.broadcast %53 : i32 to vector<4x8x16xi32>
    %55 = arith.cmpi slt, %50, %54 : vector<4x8x16xi32>
    %cst_18 = arith.constant -1.000000e+06 : f32
    %56 = vector.broadcast %cst_18 : f32 to vector<4x8x16xf32>
    %57 = arith.select %55, %49, %56 : vector<4x8x16xi1>, vector<4x8x16xf32>
    %cst_19 = arith.constant 0.000000e+00 : f32
    %58 = vector.broadcast %cst_19 : f32 to vector<4x8x1xf32>
    %cst_20 = arith.constant dense<0xFF800000> : vector<4x8xf32>
    %59 = vector.multi_reduction <maximumf>, %57, %cst_20 [2] : vector<4x8x16xf32> to vector<4x8xf32>
    %60 = vector.shape_cast %59 : vector<4x8xf32> to vector<4x8x1xf32>
    %61 = vector.broadcast %60 : vector<4x8x1xf32> to vector<4x8x16xf32>
    %62 = arith.cmpf oeq, %57, %61 : vector<4x8x16xf32>
    %63 = arith.extui %62 : vector<4x8x16xi1> to vector<4x8x16xi32>
    %64 = arith.sitofp %63 : vector<4x8x16xi32> to vector<4x8x16xf32>
    %cst_21 = arith.constant dense<0.000000e+00> : vector<4x8xf32>
    %65 = vector.multi_reduction <add>, %64, %cst_21 [2] : vector<4x8x16xf32> to vector<4x8xf32>
    %66 = vector.shape_cast %65 : vector<4x8xf32> to vector<4x8x1xf32>
    %67 = arith.addf %58, %66 : vector<4x8x1xf32>
    %cst_22 = arith.constant -3.40282347E+38 : f32
    %68 = vector.broadcast %cst_22 : f32 to vector<4x8x16xf32>
    %69 = arith.select %62, %68, %57 : vector<4x8x16xi1>, vector<4x8x16xf32>
    %cst_23 = arith.constant dense<0xFF800000> : vector<4x8xf32>
    %70 = vector.multi_reduction <maximumf>, %69, %cst_23 [2] : vector<4x8x16xf32> to vector<4x8xf32>
    %71 = vector.shape_cast %70 : vector<4x8xf32> to vector<4x8x1xf32>
    %72 = vector.broadcast %71 : vector<4x8x1xf32> to vector<4x8x16xf32>
    %73 = arith.cmpf oeq, %69, %72 : vector<4x8x16xf32>
    %74 = arith.extui %73 : vector<4x8x16xi1> to vector<4x8x16xi32>
    %75 = arith.sitofp %74 : vector<4x8x16xi32> to vector<4x8x16xf32>
    %cst_24 = arith.constant dense<0.000000e+00> : vector<4x8xf32>
    %76 = vector.multi_reduction <add>, %75, %cst_24 [2] : vector<4x8x16xf32> to vector<4x8xf32>
    %77 = vector.shape_cast %76 : vector<4x8xf32> to vector<4x8x1xf32>
    %78 = arith.addf %67, %77 : vector<4x8x1xf32>
    %cst_25 = arith.constant -3.40282347E+38 : f32
    %79 = vector.broadcast %cst_25 : f32 to vector<4x8x16xf32>
    %80 = arith.select %73, %79, %69 : vector<4x8x16xi1>, vector<4x8x16xf32>
    %cst_26 = arith.constant dense<0xFF800000> : vector<4x8xf32>
    %81 = vector.multi_reduction <maximumf>, %80, %cst_26 [2] : vector<4x8x16xf32> to vector<4x8xf32>
    %82 = vector.shape_cast %81 : vector<4x8xf32> to vector<4x8x1xf32>
    %83 = vector.broadcast %82 : vector<4x8x1xf32> to vector<4x8x16xf32>
    %84 = arith.cmpf oeq, %80, %83 : vector<4x8x16xf32>
    %85 = arith.extui %84 : vector<4x8x16xi1> to vector<4x8x16xi32>
    %86 = arith.sitofp %85 : vector<4x8x16xi32> to vector<4x8x16xf32>
    %cst_27 = arith.constant dense<0.000000e+00> : vector<4x8xf32>
    %87 = vector.multi_reduction <add>, %86, %cst_27 [2] : vector<4x8x16xf32> to vector<4x8xf32>
    %88 = vector.shape_cast %87 : vector<4x8xf32> to vector<4x8x1xf32>
    %89 = arith.addf %78, %88 : vector<4x8x1xf32>
    %cst_28 = arith.constant -3.40282347E+38 : f32
    %90 = vector.broadcast %cst_28 : f32 to vector<4x8x16xf32>
    %91 = arith.select %84, %90, %80 : vector<4x8x16xi1>, vector<4x8x16xf32>
    %cst_29 = arith.constant dense<0xFF800000> : vector<4x8xf32>
    %92 = vector.multi_reduction <maximumf>, %91, %cst_29 [2] : vector<4x8x16xf32> to vector<4x8xf32>
    %93 = vector.shape_cast %92 : vector<4x8xf32> to vector<4x8x1xf32>
    %cst_30 = arith.constant 4.000000e+00 : f32
    %94 = vector.broadcast %cst_30 : f32 to vector<4x8x1xf32>
    %95 = arith.cmpf oge, %89, %94 : vector<4x8x1xf32>
    %96 = arith.select %95, %82, %93 : vector<4x8x1xi1>, vector<4x8x1xf32>
    %cst_31 = arith.constant 4.000000e+00 : f32
    %97 = vector.broadcast %cst_31 : f32 to vector<4x8x1xf32>
    %98 = arith.cmpf oge, %78, %97 : vector<4x8x1xf32>
    %99 = arith.select %98, %71, %96 : vector<4x8x1xi1>, vector<4x8x1xf32>
    %cst_32 = arith.constant 4.000000e+00 : f32
    %100 = vector.broadcast %cst_32 : f32 to vector<4x8x1xf32>
    %101 = arith.cmpf oge, %67, %100 : vector<4x8x1xf32>
    %102 = arith.select %101, %60, %99 : vector<4x8x1xi1>, vector<4x8x1xf32>
    %103 = vector.broadcast %102 : vector<4x8x1xf32> to vector<4x8x16xf32>
    %104 = arith.cmpf olt, %57, %103 : vector<4x8x16xf32>
    %cst_33 = arith.constant -1.000000e+06 : f32
    %105 = vector.broadcast %cst_33 : f32 to vector<4x8x16xf32>
    %106 = arith.select %104, %105, %57 : vector<4x8x16xi1>, vector<4x8x16xf32>
    %107 = vector.broadcast %60 : vector<4x8x1xf32> to vector<4x8x16xf32>
    %108 = arith.subf %106, %107 : vector<4x8x16xf32>
    %109 = math.exp %108 : vector<4x8x16xf32>
    %cst_34 = arith.constant dense<0.000000e+00> : vector<4x8xf32>
    %110 = vector.multi_reduction <add>, %109, %cst_34 [2] : vector<4x8x16xf32> to vector<4x8xf32>
    %111 = vector.shape_cast %110 : vector<4x8xf32> to vector<4x8x1xf32>
    %112 = tpu.reciprocal %111 {approx = true} : vector<4x8x1xf32> -> vector<4x8x1xf32>
    %113 = vector.broadcast %112 : vector<4x8x1xf32> to vector<4x8x16xf32>
    %114 = arith.mulf %109, %113 : vector<4x8x16xf32>
    %115 = arith.truncf %114 : vector<4x8x16xf32> to vector<4x8x16xbf16>
    "tpu.trace_start"() <{level = 10 : i32, message = "bqk,bkd->bqd"}> : () -> ()
    %cst_35 = arith.constant dense<0.000000e+00> : vector<4x8x8xf32>
    %116 = tpu.matmul %115, %48, %cst_35 {dimension_numbers = #tpu.dot_dimension_numbers<[2], [1], [1], [2], [0, 0, 0, 1, 1, 2], [0], [0]>} : vector<4x8x16xbf16>, vector<4x16x8xbf16>, vector<4x8x8xf32> -> vector<4x8x8xf32>
    "tpu.trace_stop"() : () -> ()
    %117 = arith.truncf %116 : vector<4x8x8xf32> to vector<4x8x8xbf16>
    %118 = vector.shape_cast %117 : vector<4x8x8xbf16> to vector<1x4x8x8xbf16>
    %119 = vector.extract_strided_slice %118 {offsets = [0, 0, 0, 0], sizes = [1, 1, 8, 8], strides = [1, 1, 1, 1]} : vector<1x4x8x8xbf16> to vector<1x1x8x8xbf16>
    %120 = vector.shape_cast %119 : vector<1x1x8x8xbf16> to vector<1x8x8xbf16>
    %121 = vector.extract_strided_slice %118 {offsets = [0, 1, 0, 0], sizes = [1, 1, 8, 8], strides = [1, 1, 1, 1]} : vector<1x4x8x8xbf16> to vector<1x1x8x8xbf16>
    %122 = vector.shape_cast %121 : vector<1x1x8x8xbf16> to vector<1x8x8xbf16>
    %123 = vector.extract_strided_slice %118 {offsets = [0, 2, 0, 0], sizes = [1, 1, 8, 8], strides = [1, 1, 1, 1]} : vector<1x4x8x8xbf16> to vector<1x1x8x8xbf16>
    %124 = vector.shape_cast %123 : vector<1x1x8x8xbf16> to vector<1x8x8xbf16>
    %125 = vector.extract_strided_slice %118 {offsets = [0, 3, 0, 0], sizes = [1, 1, 8, 8], strides = [1, 1, 1, 1]} : vector<1x4x8x8xbf16> to vector<1x1x8x8xbf16>
    %126 = vector.shape_cast %125 : vector<1x1x8x8xbf16> to vector<1x8x8xbf16>
    %127 = tpu.concatenate %120, %122, %124, %126 in 2 : vector<1x8x8xbf16>, vector<1x8x8xbf16>, vector<1x8x8xbf16>, vector<1x8x8xbf16> -> vector<1x8x32xbf16>
    %128 = vector.shape_cast %127 : vector<1x8x32xbf16> to vector<8x32xbf16>
    %c0_36 = arith.constant 0 : index
    %c0_37 = arith.constant 0 : index
    %129 = vector.load %arg8[%c0_36, %c0_37] : memref<32x32xbf16, #tpu.memory_space<vmem>>, vector<32x32xbf16>
    %cst_38 = arith.constant dense<0.000000e+00> : vector<8x32xf32>
    %130 = tpu.matmul %128, %129, %cst_38 {dimension_numbers = #tpu.dot_dimension_numbers<[1], [0], [0], [1], [0, 0, 1, 1], [], []>} : vector<8x32xbf16>, vector<32x32xbf16>, vector<8x32xf32> -> vector<8x32xf32>
    %131 = vector.shape_cast %130 : vector<8x32xf32> to vector<1x8x32xf32>
    %c0_39 = arith.constant 0 : index
    %c0_40 = arith.constant 0 : index
    %c0_41 = arith.constant 0 : index
    %132 = vector.load %arg9[%c0_39, %c0_40, %c0_41] : memref<1x8x32xf32, #tpu.memory_space<vmem>>, vector<1x8x32xf32>
    tpu.vector_store %arg9[%c0_39, %c0_40, %c0_41], %131 {strides = array<i32>} : memref<1x8x32xf32, #tpu.memory_space<vmem>>, vector<1x8x32xf32>,
    return
  }
  func.func @transform_0(%arg0: i32, %arg1: memref<2xi32, #tpu.memory_space<smem>>) -> (i32, i32, i32) {
    %c0_i32 = arith.constant 0 : i32
    %c0_i32_0 = arith.constant 0 : i32
    %c0_i32_1 = arith.constant 0 : i32
    return %arg0, %c0_i32, %c0_i32_0 : i32, i32, i32
  }
  func.func @transform_1(%arg0: i32, %arg1: memref<2xi32, #tpu.memory_space<smem>>) -> (i32, i32, i32) {
    %c0_i32 = arith.constant 0 : i32
    %c0_i32_0 = arith.constant 0 : i32
    %c0_i32_1 = arith.constant 0 : i32
    return %arg0, %c0_i32, %c0_i32_0 : i32, i32, i32
  }
  func.func @transform_2(%arg0: i32, %arg1: memref<2xi32, #tpu.memory_space<smem>>) -> (i32, i32, i32) {
    %c0_i32 = arith.constant 0 : i32
    %c0_i32_0 = arith.constant 0 : i32
    %c0_i32_1 = arith.constant 0 : i32
    return %arg0, %c0_i32, %c0_i32_0 : i32, i32, i32
  }
  func.func @transform_3(%arg0: i32, %arg1: memref<2xi32, #tpu.memory_space<smem>>) -> (i32, i32) {
    %c0_i32 = arith.constant 0 : i32
    %c0_i32_0 = arith.constant 0 : i32
    %c0_i32_1 = arith.constant 0 : i32
    return %c0_i32, %c0_i32_0 : i32, i32
  }
  func.func @transform_4(%arg0: i32, %arg1: memref<2xi32, #tpu.memory_space<smem>>) -> (i32, i32) {
    %c0_i32 = arith.constant 0 : i32
    %c0_i32_0 = arith.constant 0 : i32
    %c0_i32_1 = arith.constant 0 : i32
    return %c0_i32, %c0_i32_0 : i32, i32
  }
  func.func @transform_5(%arg0: i32, %arg1: memref<2xi32, #tpu.memory_space<smem>>) -> (i32, i32) {
    %c0_i32 = arith.constant 0 : i32
    %c0_i32_0 = arith.constant 0 : i32
    %c0_i32_1 = arith.constant 0 : i32
    return %c0_i32, %c0_i32_0 : i32, i32
  }
  func.func @transform_6(%arg0: i32, %arg1: memref<2xi32, #tpu.memory_space<smem>>) -> (i32, i32) {
    %c0_i32 = arith.constant 0 : i32
    %c0_i32_0 = arith.constant 0 : i32
    %c0_i32_1 = arith.constant 0 : i32
    return %c0_i32, %c0_i32_0 : i32, i32
  }
  func.func @transform_7(%arg0: i32, %arg1: memref<2xi32, #tpu.memory_space<smem>>) -> (i32, i32, i32) {
    %c0_i32 = arith.constant 0 : i32
    %c0_i32_0 = arith.constant 0 : i32
    %c0_i32_1 = arith.constant 0 : i32
    return %arg0, %c0_i32, %c0_i32_0 : i32, i32, i32
  }
}

</mosaic_0001>

<bundles_post_ra>
// kernel: tpu_custom_call.1
= control target key start
LH: loop header
LB: loop body
LE: loop exit
PB: predicated region body
PF: predicated region fallthrough
CT: control target
= control target key end

     0   :  { %s2233_s27 = smov [#allocation3]   ;;  %s2868_s0 = inlined_call_operand.hbm [shape: s32[2], index: 0, kind: input, shape index: {}]   ;;  %s2869_s1 = inlined_call_operand.hbm [shape: f32[2,8,16], index: 1, kind: input, shape index: {}]   ;;  %s2870_s2 = inlined_call_operand.hbm [shape: f32[2,16,32], index: 2, kind: input, shape index: {}]   ;;  %s2871_s3 = inlined_call_operand.hbm [shape: f32[2,16,24], index: 3, kind: input, shape index: {}]   ;;  %s2872_s4 = inlined_call_operand.hbm [shape: f32[16,32], index: 4, kind: input, shape index: {}]   ;;  %s2873_s5 = inlined_call_operand.hbm [shape: f32[32,32], index: 5, kind: input, shape index: {}]   ;;  %s2874_s6 = inlined_call_operand.hbm [shape: bf16[24,32], index: 6, kind: input, shape index: {}]   ;;  %s2875_s7 = inlined_call_operand.hbm [shape: bf16[32,32], index: 7, kind: input, shape index: {}]   ;;  %s2876_s8 = inlined_call_operand.hbm [shape: f32[2,8,32], index: 8, kind: output, shape index: {}]  }
   0x1   :  { %2897 = sst [smem:[#allocation28_spill]] %s2870_s2 }
   0x2   :  { %2898 = sst [smem:[#allocation29_spill]] %s2872_s4 }
   0x3   :  { %2899 = sst [smem:[#allocation30_spill]] %s2873_s5 }
   0x4   :  { %2900 = sst [smem:[#allocation31_spill]] %s2874_s6 }
   0x5   :  { %2901 = sst [smem:[#allocation32_spill]] %s2876_s8 }
   0x6   :  { %14 = dma.hbm_to_smem %s2868_s0, 16, %s2233_s27, [#allocation2] }
   0x7   :  { %2195 = dma.done.wait [#allocation2], 16 }
   0x8   :  { %2196 = vsyncadd [#allocation2], 4294967280 }
   0x9   :  { %16 = sfence }
   0xa   :  { %17 = vsyncpa [#allocation5], 0 }
   0xb   :  { %19 = vsyncpa [#allocation5 + $0x1], 0 }
   0xc   :  { %20 = vsyncpa [#allocation8], 0 }
   0xd   :  { %22 = vsyncpa [#allocation8 + $0x1], 0 }
   0xe   :  { %23 = vsyncpa [#allocation11], 0 }
   0xf   :  { %24 = vsyncpa [#allocation14], 0 }
  0x10   :  { %25 = vsyncpa [#allocation6], 0 }
  0x11   :  { %27 = vsyncpa [#allocation6 + $0x1], 0  ;;  %s2302_s30 = smov 0   ;;  %s2304_s9 = smov 0  }
  0x12   :  { %s2306_s10 = smov 0   ;;  %s2308_s11 = smov 0  }
  0x13 LB: > { %2902 = sst [smem:[#allocation23_spill]] %s2219_s30  ;;  %s2323_s0 = sadd.s32 4294967295, %s2231_s11   ;;  %s2231_s11 = sphi %s2308_s11, %s2940_s11   ;;  %s2227_s10 = sphi %s2306_s10, %s2942_s10   ;;  %s2223_s9 = sphi %s2304_s9, %s2944_s9   ;;  %s2219_s30 = sphi %s2302_s30, %s2943_s30  }
  0x14   : > { %2903 = sst [smem:[#allocation24_spill]] %s2227_s10  ;;  %s1639_s12 = sadd.s32 4294967294, %s2231_s11  }
  0x15   : > { %p53_p0 = scmp.ne.s32.totalorder %s2223_s9, %s2219_s30  ;;  %p2885_p1 = scmp.eq.s32.totalorder %s2323_s0, 0 }
  0x16   : > { %p213_p2 = scmp.eq.s32.totalorder %s2323_s0, 1  ;;  %p219_p3 = scmp.eq.s32.totalorder %s1639_s12, 1 }
  0x17   : > { %p2332_p4 = por %p2885_p1, %p53_p0  ;;  %p1640_p5 = scmp.ge.s32.totalorder %s2231_s11, 1 }
  0x18   : > { %p2337_p6 = por %p219_p3, %p53_p0  ;;  %p226_p7 = scmp.lt.s32.totalorder %s2231_s11, 3 }
  0x19   : > { %s2904_s13 = scalar_select %p2332_p4, 1, 0 }
  0x1a   : > { %s2905_s14 = scalar_select %p2337_p6, 1, 0 }
  0x1b   : > { %p2342_p8 = pnand %p1640_p5, %p226_p7  ;;  %s2234_s16 = smov [#allocation10]  }
  0x1c   : > { %2906 = sst [smem:[#allocation25_spill]] %s2905_s14  ;;  %s238_s17 = sshll.u32 %s2234_s16, 4  ;;  %s239_s17 = int_to_ptr.vmem [resolvable:$true] %s238_s17 }
  0x1d   : > { %s2907_s15 = scalar_select %p2342_p8, 1, 0 }
  0x1e   : > { %p1851_p9 = pneg %p2342_p8  ;;  %s2235_s19 = smov [#allocation13]  }
  0x1f   : > { %s264_s20 = sshll.u32 %s2235_s19, 4  ;;  %s1976_s21 = scalar_lea.vmem %s239_s17, 256  ;;  %s265_s20 = int_to_ptr.vmem [resolvable:$true] %s264_s20 }
  0x20   : > { %p2351_p11 = pnand %p1851_p9, %p2885_p1  ;;  %p1977_p13 = scmp.ne.s32.totalorder %s239_s17, %s1976_s21 }
  0x21   : > { %p1984_p5 = scmp.lt.s32.totalorder %s239_s17, %s239_s17  ;;  %p1985_p7 = scmp.lt.s32.totalorder %s1976_s21, %s1976_s21 }
  0x22   : > { %s2908_s18 = scalar_select %p2351_p11, 1, 0 }
  0x23   : > { %p2886_p12 = pneg %p2351_p11  ;;  %p1986_p10 = por %p1985_p7, %p1984_p5 }
  0x25   : > { %p1979_p0 = pnand %p1977_p13, %p2886_p12 }
  0x27   : > { %p1980_p3 = pneg %p1979_p0 }
  0x29   : > { %p1987_p9 = pnand %p1986_p10, %p1980_p3 }
  0x2b   : > { %1990 = shalt.err (!%p1987_p9)
}
  0x2c   : > { %s2879_s22 = smov 128   ;;  %s2881_s23 = smov 8  }
  0x2d   : > { %s2909_s4 = sld [smem:[#allocation29_spill]]  ;;  %s2002_s26 = scalar_lea.vmem %s265_s20, 192 }
  0x2e   : > { %p2003_p13 = scmp.ne.s32.totalorder %s265_s20, %s2002_s26  ;;  %p2010_p10 = scmp.lt.s32.totalorder %s265_s20, %s265_s20 }
  0x2f   : > { %p2011_p3 = scmp.lt.s32.totalorder %s2002_s26, %s2002_s26 }
  0x30   : > { %p2005_p0 = pnand %p2003_p13, %p2886_p12 }
  0x31   : > { %p2012_p7 = por %p2011_p3, %p2010_p10 }
  0x32   : > { %p2006_p5 = pneg %p2005_p0 }
  0x33   : > { %1854 = dma.hbm_to_vmem [thread:$0]  (!%p2351_p11), %s2909_s4, 256, %s239_s17, [#allocation11], %s2879_s22, %s2879_s22, %s2881_s23  }
  0x34   : > { %p2013_p9 = pnand %p2012_p7, %p2006_p5 }
  0x36   : > { %2016 = shalt.err (!%p2013_p9)
}
  0x37   : > { %s2877_s27 = smov 64   ;;  %s2878_s28 = smov 4  }
  0x38   : > { %s2910_s6 = sld [smem:[#allocation31_spill]]  ;;  %s2380_s16 = sadd.s32 1, %s2231_s11  }
  0x39   : > { %2911 = sst [smem:[#allocation26_spill]] %s2380_s16  ;;  %s37_s17 = ssub.s32 %s2231_s11, %s2380_s16 }
  0x3a   : > { %p38_p13 = scmp.eq.s32.totalorder %s37_s17, 0  ;;  %s40_s19 = sadd.s32 1, %s2227_s10 }
  0x3b   : > { %p47_p0 = scmp.ne.s32.totalorder %s2227_s10, %s2223_s9  ;;  %p48_p5 = scmp.eq.s32.totalorder %s2231_s11, 0 }
  0x3c   : > { %s2389_s21 = scalar_select %p38_p13, %s2227_s10, %s40_s19  }
  0x3d   : > { %p49_p10 = por %p48_p5, %p47_p0  ;;  %p2393_p3 = por %p213_p2, %p47_p0 }
  0x3e   : > { %1860 = dma.hbm_to_vmem [thread:$0]  (!%p2351_p11), %s2910_s6, 192, %s265_s20, [#allocation14], %s2877_s27, %s2877_s27, %s2878_s28  }
  0x3f   : > { %2912 = sst [smem:[#allocation27_spill]] %s2389_s21  ;;  %p1882_p7 = scmp.lt.s32.totalorder %s2231_s11, 2 }
  0x40   : > { %s2913_s24 = scalar_select %p2393_p3, 1, 0 }
  0x41   : > { %s2399_s25 = sand.u32 1, %s2227_s10   ;;  %s309_s20 = sand.u32 1, %s2231_s11  }
  0x42   : > { %s2884_s26 = sshll.u32 %s2399_s25, 4  ;;  %p2403_p9 = pnand %p1882_p7, %p49_p10 }
  0x43   : > { %s1704_s12 = sshll.u32 %s2231_s11, 8  ;;  %s2915_s2 = sld [smem:[#allocation28_spill]] }
  0x44   : > { %s313_s28 = scalar_lea.vmem [#allocation7], %s2884_s26  ;;  %s2420_s6 = scalar_lea.hbm %s2871_s3, %s1704_s12 }
  0x45   : > { %s320_s22 = sshll.u32 %s313_s28, 4  ;;  %s2422_s21 = scalar_lea.sflag [#allocation8], %s309_s20  ;;  %s2415_s22 = int_to_ptr.vmem [resolvable:$true] %s320_s22 }
  0x46   : > { %p2428_p13 = pneg %p2403_p9 }
  0x49   : > { %s2411_s27 = scalar_lea.hbm %s2915_s2, %s1704_s12  ;;  %s2022_s26 = scalar_lea.hbm %s2915_s2, 512 }
  0x4a   : > { %s2017_s10 = scalar_lea.hbm %s2411_s27, 256  ;;  %p2023_p10 = scmp.lt.s32.totalorder %s2411_s27, %s2915_s2 }
  0x4b   : > { %p2018_p2 = scmp.ne.s32.totalorder %s2411_s27, %s2017_s10  ;;  %p2024_p7 = scmp.lt.s32.totalorder %s2022_s26, %s2017_s10 }
  0x4d   : > { %p2020_p0 = pnand %p2428_p13, %p2018_p2  ;;  %p2025_p1 = por %p2024_p7, %p2023_p10 }
  0x4f   : > { %p2021_p5 = pneg %p2020_p0 }
  0x51   : > { %p2026_p12 = pnand %p2025_p1, %p2021_p5 }
  0x53   : > { %2029 = shalt.err (!%p2026_p12)
}
  0x54   : > { %s2030_s20 = scalar_lea.vmem %s2415_s22, 256  ;;  %s2240_s12 = smov [#allocation7]  }
  0x55   : > { %p2031_p6 = scmp.ne.s32.totalorder %s2415_s22, %s2030_s20  ;;  %s2035_s28 = sshll.u32 %s2240_s12, 4  ;;  %s2036_s28 = int_to_ptr.vmem [resolvable:$false] %s2035_s28 }
  0x56   : > { %s2037_s19 = scalar_lea.vmem %s2036_s28, 512  ;;  %p2038_p3 = scmp.lt.s32.totalorder %s2415_s22, %s2036_s28 }
  0x57   : > { %p2033_p2 = pnand %p2031_p6, %p2428_p13  ;;  %p2039_p4 = scmp.lt.s32.totalorder %s2037_s19, %s2030_s20 }
  0x59   : > { %p2034_p0 = pneg %p2033_p2  ;;  %p2040_p8 = por %p2039_p4, %p2038_p3 }
  0x5b   : > { %p2041_p11 = pnand %p2040_p8, %p2034_p0 }
  0x5d   : > { %2044 = shalt.err (!%p2041_p11)
}
  0x5e   : > { %s2917_s10 = smov 8   ;;  %s2918_s26 = smov 128  }
  0x5f   : > { %1870 = dma.hbm_to_vmem [thread:$0]  (!%p2403_p9), %s2411_s27, 256, %s2415_s22, %s2422_s21, %s2918_s26, %s2918_s26, %s2917_s10  }
  0x60   : > { %s2919_s4 = sshll.u32 %s2399_s25, 4  ;;  %s2241_s20 = smov [#allocation12]  }
  0x61   : > { %s334_s23 = scalar_lea.vmem [#allocation9], %s2919_s4  ;;  %s251_s28 = sshll.u32 %s2241_s20, 4  ;;  %s252_s28 = int_to_ptr.vmem [resolvable:$true] %s251_s28 }
  0x62   : > { %s341_s12 = sshll.u32 %s334_s23, 4  ;;  %s2056_s19 = scalar_lea.vmem %s252_s28, 512  ;;  %s2456_s12 = int_to_ptr.vmem [resolvable:$true] %s341_s12 }
  0x63   : > { %p2057_p1 = scmp.ne.s32.totalorder %s252_s28, %s2056_s19  ;;  %p2920_p4 = scmp.ne.s32.totalorder %s2908_s18, 0 }
  0x64   : > { %p2064_p12 = scmp.lt.s32.totalorder %s252_s28, %s252_s28  ;;  %p2065_p3 = scmp.lt.s32.totalorder %s2056_s19, %s2056_s19 }
  0x65   : > { %p2921_p6 = pneg %p2920_p4 }
  0x66   : > { %p2066_p5 = por %p2065_p3, %p2064_p12 }
  0x67   : > { %p2059_p8 = pnand %p2057_p1, %p2921_p6 }
  0x69   : > { %p2060_p11 = pneg %p2059_p8 }
  0x6b   : > { %p2067_p10 = pnand %p2066_p5, %p2060_p11 }
  0x6d   : > { %2070 = shalt.err (!%p2067_p10)
}
  0x6e   : > { %s2922_s5 = sld [smem:[#allocation30_spill]]  ;;  %s2242_s4 = smov [#allocation15]  }
  0x6f   : > { %s277_s23 = sshll.u32 %s2242_s4, 4  ;;  %s1646_s20 = sshll.u32 %s2399_s25, 3  ;;  %s278_s23 = int_to_ptr.vmem [resolvable:$true] %s277_s23 }
  0x70   : > { %s2082_s2 = scalar_lea.vmem %s278_s23, 256  ;;  %p2923_p2 = pmov %p2921_p6 }
  0x71   : > { %p2083_p7 = scmp.ne.s32.totalorder %s278_s23, %s2082_s2  ;;  %p2090_p6 = scmp.lt.s32.totalorder %s278_s23, %s278_s23 }
  0x72   : > { %p2091_p8 = scmp.lt.s32.totalorder %s2082_s2, %s2082_s2 }
  0x73   : > { %p2085_p0 = pnand %p2083_p7, %p2923_p2 }
  0x74   : > { %1857 = dma.hbm_to_vmem [thread:$0]  (!%p2920_p4), %s2922_s5, 512, %s252_s28, [#allocation11], %s2918_s26, %s2918_s26, %s2917_s10  }
  0x75   : > { %p2086_p1 = pneg %p2085_p0  ;;  %p2092_p11 = por %p2091_p8, %p2090_p6 }
  0x77   : > { %p2093_p12 = pnand %p2092_p11, %p2086_p1 }
  0x79   : > { %2096 = shalt.err (!%p2093_p12)
}
  0x7a   : > { %s2924_s19 = smov 4   ;;  %s2925_s22 = smov 64  }
  0x7b   : > { %1863 = dma.hbm_to_vmem [thread:$0]  (!%p2920_p4), %s2875_s7, 256, %s278_s23, [#allocation14], %s2925_s22, %s2925_s22, %s2924_s19  }
  0x7c   : > { %s1647_s4 = sshll.u32 %s2231_s11, 7  ;;  %s295_s18 = scalar_lea.vmem [#allocation4], %s1646_s20 }
  0x7d   : > { %s2485_s2 = scalar_lea.hbm %s2869_s1, %s1647_s4  ;;  %s302_s14 = sshll.u32 %s295_s18, 4  ;;  %s303_s14 = int_to_ptr.vmem [resolvable:$true] %s302_s14 }
  0x7e   : > { %s292_s30 = scalar_lea.sflag [#allocation5], %s2399_s25  ;;  %s2097_s8 = scalar_lea.hbm %s2485_s2, 128 }
  0x7f   : > { %p2098_p3 = scmp.ne.s32.totalorder %s2485_s2, %s2097_s8  ;;  %s2102_s19 = scalar_lea.hbm %s2869_s1, 256 }
  0x80   : > { %p2103_p4 = scmp.lt.s32.totalorder %s2485_s2, %s2869_s1  ;;  %p2104_p7 = scmp.lt.s32.totalorder %s2102_s19, %s2097_s8 }
  0x81   : > { %p2100_p5 = pnand %p2098_p3, %p2428_p13 }
  0x82   : > { %p2105_p2 = por %p2104_p7, %p2103_p4 }
  0x83   : > { %p2101_p10 = pneg %p2100_p5 }
  0x85   : > { %p2106_p0 = pnand %p2105_p2, %p2101_p10 }
  0x87   : > { %2109 = shalt.err (!%p2106_p0)
}
  0x88   : > { %s2110_s16 = scalar_lea.vmem %s303_s14, 128  ;;  %s2243_s25 = smov [#allocation4]  }
  0x89   : > { %p2111_p1 = scmp.ne.s32.totalorder %s303_s14, %s2110_s16  ;;  %s2115_s20 = sshll.u32 %s2243_s25, 4  ;;  %s2116_s20 = int_to_ptr.vmem [resolvable:$false] %s2115_s20 }
  0x8a   : > { %s2117_s27 = scalar_lea.vmem %s2116_s20, 256  ;;  %p2118_p11 = scmp.lt.s32.totalorder %s303_s14, %s2116_s20 }
  0x8b   : > { %p2113_p6 = pnand %p2111_p1, %p2428_p13  ;;  %p2119_p12 = scmp.lt.s32.totalorder %s2117_s27, %s2110_s16 }
  0x8d   : > { %p2114_p8 = pneg %p2113_p6  ;;  %p2120_p3 = por %p2119_p12, %p2118_p11 }
  0x8f   : > { %p2121_p5 = pnand %p2120_p3, %p2114_p8 }
  0x91   : > { %2124 = shalt.err (!%p2121_p5)
}
  0x92   : > { %1867 = dma.hbm_to_vmem [thread:$0]  (!%p2403_p9), %s2485_s2, 128, %s303_s14, %s292_s30  }
  0x93   : > { %s2125_s8 = scalar_lea.hbm %s2420_s6, 256  ;;  %s2130_s28 = scalar_lea.hbm %s2871_s3, 512 }
  0x94   : > { %p2126_p10 = scmp.ne.s32.totalorder %s2420_s6, %s2125_s8  ;;  %p2131_p2 = scmp.lt.s32.totalorder %s2420_s6, %s2871_s3 }
  0x95   : > { %p2132_p0 = scmp.lt.s32.totalorder %s2130_s28, %s2125_s8 }
  0x96   : > { %p2128_p4 = pnand %p2126_p10, %p2428_p13 }
  0x97   : > { %p2133_p1 = por %p2132_p0, %p2131_p2 }
  0x98   : > { %p2129_p7 = pneg %p2128_p4 }
  0x9a   : > { %p2134_p6 = pnand %p2133_p1, %p2129_p7 }
  0x9c   : > { %2137 = shalt.err (!%p2134_p6)
}
  0x9d   : > { %s2138_s30 = scalar_lea.vmem %s2456_s12, 256  ;;  %s2244_s14 = smov [#allocation9]  }
  0x9e   : > { %p2139_p8 = scmp.ne.s32.totalorder %s2456_s12, %s2138_s30  ;;  %s2143_s2 = sshll.u32 %s2244_s14, 4  ;;  %s2144_s2 = int_to_ptr.vmem [resolvable:$false] %s2143_s2 }
  0x9f   : > { %s2145_s22 = scalar_lea.vmem %s2144_s2, 512  ;;  %p2146_p3 = scmp.lt.s32.totalorder %s2456_s12, %s2144_s2 }
  0xa0   : > { %p2141_p11 = pnand %p2139_p8, %p2428_p13  ;;  %p2147_p5 = scmp.lt.s32.totalorder %s2145_s22, %s2138_s30 }
  0xa2   : > { %p2142_p12 = pneg %p2141_p11  ;;  %p2148_p10 = por %p2147_p5, %p2146_p3 }
  0xa4   : > { %p2149_p4 = pnand %p2148_p10, %p2142_p12 }
  0xa6   : > { %2152 = shalt.err (!%p2149_p4)
}
  0xa7   : > { %1873 = dma.hbm_to_vmem [thread:$0]  (!%p2403_p9), %s2420_s6, 256, %s2456_s12, %s2422_s21, %s2918_s26, %s2918_s26, %s2917_s10  }
  0xa8   : > { %p2926_p13 = scmp.ne.s32.totalorder %s2907_s15, 0 }
  0xa9   : > { %s2531_s17 = sand.u32 (!%p2926_p13), 1, %s2223_s9   ;;  %p2927_p7 = scmp.ne.s32.totalorder (!%p2926_p13), %s2904_s13, 0 }
  0xaa   : > { %353 = sbr.rel (%p2926_p13) target bundleno = 2024 (0x7e8), region = 48  ;;  %s1655_s5 = sshll.u32 (!%p2926_p13), %s2531_s17, 3 }
  0xab   : > { %s356_s16 = scalar_lea.sflag (!%p2926_p13), [#allocation5], %s2531_s17  ;;  %s359_s29 = scalar_lea.vmem (!%p2926_p13), [#allocation4], %s1655_s5 }
  0xaf   : > { %2198 = dma.done.wait (%p2927_p7), %s356_s16, 128  }
  0xb0   : > { %2200 = vsyncadd (%p2927_p7), %s356_s16, 4294967168  ;;  %s364_s6 = sand.u32 1, %s2323_s0   ;;  %s1656_s15 = sshll.u32 %s2531_s17, 4 }
  0xb1   : > { %s365_s21 = scalar_lea.sflag [#allocation8], %s364_s6  ;;  %s2543_s10 = scalar_lea.vmem [#allocation7], %s1656_s15 }
  0xb2   : > { %2202 = dma.done.wait (%p2927_p7), %s365_s21, 512  }
  0xb3   : > { %2204 = vsyncadd (%p2927_p7), %s365_s21, 4294966784  ;;  %s2549_s26 = scalar_lea.vmem [#allocation9], %s1656_s15  ;;  %p2928_p9 = scmp.eq.s32.totalorder %s2323_s0, 0 }
  0xb5   : > { %2206 = dma.done.wait (%p2928_p9), [#allocation11], 768   ;;  %p2929_p2 = pmov %p2928_p9 }
  0xb7   : > { %2208 = vsyncadd (%p2929_p2), [#allocation11], 4294966528  ;;  %p2930_p0 = pmov %p2929_p2 }
  0xb9   : > { %2210 = dma.done.wait (%p2930_p0), [#allocation14], 448   ;;  %p2931_p1 = pmov %p2930_p0 }
  0xba   : > { %v2245_v0 = vmov 0.0   ;;  %vm2246_vm0 = vmmov 0   ;;  %v441_v1 = vld [vmem:[#allocation10 + $0x8] sm:$0xff]  ;;  %v440_v3 = vld [vmem:[#allocation10] sm:$0xff]  ;;  %v435_v5 = vld [vmem:[%s359_s29] sm:$0xff]  ;;  %vm442_vm1 = vcmask 130048   ;;  %v1002_v35 = vlaneseq }
  0xbb   : > { %2212 = vsyncadd (%p2931_p1), [#allocation14], 4294966848  ;;  %1741 = vmatprep.subr.mxu0 %v2245_v0  ;;  %1745 = vmatprep.mubr.msk.f32.mxu0 %vm2246_vm0, %v2245_v0  ;;  %v520_v2 = vld [vmem:[#allocation12 + $0x18] sm:$0xff]  ;;  %v519_v4 = vld [vmem:[#allocation12 + $0x10] sm:$0xff]  ;;  %vm521_vm2 = vcmask 261120   ;;  %vm620_vm3 = vcmask 1043456  }
  0xbc   : > { %1742 = vmatpush3.msra.mxu0 %v441_v1  ;;  %1748 = vmatprep.subr.mxu1 %v520_v2  ;;  %v518_v6 = vld [vmem:[#allocation12 + $0x8] sm:$0xff]  ;;  %v517_v7 = vld [vmem:[#allocation12] sm:$0xff]  ;;  %vm616_vm4 = vcmask 195584   ;;  %s2247_s13 = smov 120   ;;  %vm697_vm5 = vcmask 64512   ;;  %s2248_s12 = smov 112  }
  0xbd   : > { %1743 = vmatprep.subr.mxu0 %v2245_v0  ;;  %1749 = vmatpush3.msra.mxu1 %v520_v2  ;;  %v436_v8 = vld [vmem:[%s2543_s10] sm:$0xff]  ;;  %v437_v9 = vld [vmem:[%s2543_s10 + $0x8] sm:$0xff]  ;;  %s2249_s25 = smov 104   ;;  %s1004_s20 = sld [smem:[#allocation3 + %s2323_s0]]  ;;  %v1003_v36 = vand.u32 127, %v1002_v35 }
  0xbe   : > { %1744 = vmatpush3.msra.mxu0 %v440_v3  ;;  %1750 = vmatprep.subr.mxu1 %v519_v4  ;;  %v1937_v10 = vld [vmem:[#allocation13 + $0x8] ss:$0 sps:$4 sm:$0xff]   ;;  %v1938_v12 = vld [vmem:[#allocation13] sm:$0xff]   ;;  %s2250_s27 = smov 8   ;;  %s2251_s8 = smov 16  }
  0xbf   : > { %1746 = vmatmul.mubr.msk.f32.vlgmr.msra.gmra.mxu0 %vm442_vm1, %v435_v5  ;;  %1751 = vmatpush3.msra.mxu1 %v519_v4  ;;  %v622_v11 = vsel %vm620_vm3, %v1937_v10, 0  ;;  %v438_v13 = vld [vmem:[%s2549_s26] sm:$0xff]  ;;  %v439_v14 = vld [vmem:[%s2549_s26 + $0x8] sm:$0xff]  ;;  %s2252_s4 = smov 24   ;;  %s1701_s18 = sshll.u32 %s2323_s0, 7 }
  0xc0   : > { %1752 = vmatprep.subr.mxu1 %v518_v6  ;;  %1756 = vmatprep.mubr.msk.f32.mxu1 %vm521_vm2, %v436_v8  ;;  %v603_v15 = vpack.c.bf16 %v439_v14, %v438_v13  ;;  %s433_s28 = scalar_lea.vmem [#allocation16], %s1655_s5  ;;  %s2934_s14 = sld [smem:[#allocation32_spill]] }
  0xc1   : > { %1753 = vmatpush3.msra.mxu1 %v518_v6  ;;  %1759 = vmatprep.subr.bf16.mxu0 %v2245_v0  ;;  %s1488_s23 = sshll.u32 %s433_s28, 4  ;;  %s1475_s22 = scalar_lea.sflag [#allocation6], %s2531_s17  ;;  %s2826_s23 = int_to_ptr.vmem [resolvable:$true] %s1488_s23 }
  0xc2   : > { %1754 = vmatprep.subr.mxu1 %v517_v7  ;;  %1763 = vmatprep.mubr.msk.bf16.mxu0 %vm2246_vm0, %v2245_v0  ;;  %s2153_s16 = scalar_lea.vmem %s2826_s23, 128  ;;  %p2935_p8 = scmp.ne.s32.totalorder %s2913_s24, 0 }
  0xc3   : > { %1755 = vmatpush3.msra.mxu1 %v517_v7  ;;  %1760 = vmatpush3.bf16.msra.mxu0 %v622_v11  ;;  %v1005_v37 = vstv %s1004_s20  ;;  %p2154_p6 = scmp.ne.s32.totalorder %s2826_s23, %s2153_s16  ;;  %s2253_s0 = smov [#allocation16]  }
  0xc4   : > { %1757 = vmatmul.mubr.msk.f32.vlgmr.msra.gmra.mxu1 %vm521_vm2, %v437_v9  ;;  %1767 = vmatprep.subr.mxu1 %v2245_v0  ;;  %vm2623_vm6 = vcmp.lt.s32.totalorder %v1003_v36, %v1005_v37  ;;  %s2157_s5 = sshll.u32 %s2253_s0, 4  ;;  %s2158_s5 = int_to_ptr.vmem [resolvable:$false] %s2157_s5 }
  0xc5   : > { %1771 = vmatprep.mubr.msk.f32.mxu1 %vm2246_vm0, %v2245_v0  ;;  %1761 = vmatprep.subr.bf16.mxu0 %v2245_v0  ;;  %p2155_p11 = pnand %p2154_p6, %p2935_p8  ;;  %s2159_s29 = scalar_lea.vmem %s2158_s5, 256 }
  0xc6   : > { %s2824_s2 = scalar_lea.hbm %s2934_s14, %s1701_s18  ;;  %p2160_p3 = scmp.lt.s32.totalorder %s2826_s23, %s2158_s5 }
  0xc7   : > { %1762 = vmatpush3.bf16.msra.mxu0 %v1938_v12  ;;  %p2156_p12 = pneg %p2155_p11  ;;  %p2161_p5 = scmp.lt.s32.totalorder %s2159_s29, %s2153_s16 }
  0xc8   : > { %1774 = vmatprep.subr.mxu0 %v2245_v0 }
  0xc9   : > { %p2162_p10 = por %p2161_p5, %p2160_p3 }
  0xca   : > { %1764 = vmatmul.mubr.msk.bf16.vlgmr.msra.gmra.mxu0 %vm616_vm4, %v603_v15 }
  0xcb   : > { %1778 = vmatprep.mubr.msk.f32.mxu0 %vm2246_vm0, %v2245_v0  ;;  %p2163_p4 = pnand %p2162_p10, %p2156_p12 }
 0x17f   : > { %v512_v16 = vpop.f32.mrf.mxu0 }
 0x180   : > { %v516_v17 = vmul.f32 0.35355338, %v512_v16 }
 0x181   : > { %v1747_v18 = vpop.f32.mrf.mxu0 }
 0x182   : > { %667 = vrot.lane.b32.xlu1 %v516_v17, %s2247_s13 }
 0x184   : > { %v1758_v19 = vpop.f32.mrf.mxu1 }
 0x185   : > { %677 = vrot.lane.b32.xlu0 %v1758_v19, %s2247_s13  ;;  %1768 = vmatpush3.xpose.msk.msra.mxu1 %vm697_vm5, %v1758_v19 }
 0x186   : > { %681 = vrot.lane.b32.xlu1 %v1758_v19, %s2248_s12  ;;  %1769 = vmatprep.subr.mxu1 %v2245_v0  ;;  %v594_v20 = vpop.f32.mrf.mxu1 }
 0x189   : > { %675 = vrot.lane.b32.xlu0 %v594_v20, %s2247_s13  ;;  %1770 = vmatpush3.xpose.msk.msra.mxu1 %vm697_vm5, %v594_v20 }
 0x18a   : > { %679 = vrot.lane.b32.xlu1 %v594_v20, %s2248_s12  ;;  %1781 = vmatprep.subr.mxu1 %v2245_v0  ;;  %v658_v21 = vpop.f32.mrf.mxu0 }
 0x18c   : > { %1772 = vmatmul.mubr.msk.f32.vlgmr.msra.gmra.mxu1 %vm697_vm5, %v516_v17  ;;  %v1765_v22 = vpop.f32.mrf.mxu0 }
 0x18d   : > { %685 = vrot.lane.b32.xlu0 %v1758_v19, %s2249_s25  ;;  %1785 = vmatprep.mubr.msk.f32.mxu1 %vm2246_vm0, %v2245_v0 }
 0x18e   : > { %669 = vrot.lane.b32.xlu1 %v516_v17, %s2248_s12  ;;  %v661_v23 = vpop.f32.mrf.mxu0 }
 0x18f   : > { %v2604_v30 = vpack.c.bf16 %v661_v23, %v658_v21 }
 0x190   : > { %v1766_v24 = vpop.f32.mrf.mxu0 }
 0x191   : > { %683 = vrot.lane.b32.xlu0 %v594_v20, %s2249_s25 }
 0x195   : > { %671 = vrot.lane.b32.xlu0 %v516_v17, %s2249_s25 }
 0x1f4   : > { %v668_v25 = vpop.permute.xlu1 %667 }
 0x1f7   : > { %v678_v26 = vpop.permute.xlu0 %677 }
 0x1f8   : > { %1775 = vmatpush3.xpose.msk.msra.mxu0 %vm697_vm5, %v678_v26  ;;  %v682_v27 = vpop.permute.xlu1 %681 }
 0x1f9   : > { %1782 = vmatpush3.xpose.msk.msra.mxu1 %vm697_vm5, %v682_v27  ;;  %1776 = vmatprep.subr.mxu0 %v2245_v0 }
 0x1fa   : > { %1783 = vmatprep.subr.mxu1 %v2245_v0 }
 0x1fb   : > { %v676_v28 = vpop.permute.xlu0 %675 }
 0x1fc   : > { %1777 = vmatpush3.xpose.msk.msra.mxu0 %vm697_vm5, %v676_v28  ;;  %v680_v29 = vpop.permute.xlu1 %679 }
 0x1fd   : > { %1784 = vmatpush3.xpose.msk.msra.mxu1 %vm697_vm5, %v680_v29  ;;  %1788 = vmatprep.subr.mxu0 %v2245_v0 }
 0x1fe   : > { %1795 = vmatprep.subr.bf16.mxu1 %v2245_v0 }
 0x1ff   : > { %v686_v31 = vpop.permute.xlu0 %685  ;;  %1779 = vmatmul.mubr.msk.f32.vlgmr.msra.gmra.mxu0 %vm697_vm5, %v668_v25 }
 0x200   : > { %1789 = vmatpush3.xpose.msk.msra.mxu0 %vm697_vm5, %v686_v31  ;;  %v670_v32 = vpop.permute.xlu1 %669  ;;  %1792 = vmatprep.mubr.msk.f32.mxu0 %vm2246_vm0, %v2245_v0 }
 0x201   : > { %1786 = vmatmul.mubr.msk.f32.vlgmr.msra.gmra.mxu1 %vm697_vm5, %v670_v32  ;;  %1790 = vmatprep.subr.mxu0 %v2245_v0 }
 0x202   : > { %1796 = vmatpush3.bf16.msra.mxu1 %v2604_v30  ;;  %1797 = vmatprep.mubr.msk.bf16.mxu1 %vm2246_vm0, %v2245_v0 }
 0x203   : > { %v684_v33 = vpop.permute.xlu0 %683  ;;  %1807 = vmatprep.subr.bf16.mxu1 %v2245_v0 }
 0x204   : > { %1791 = vmatpush3.xpose.msk.msra.mxu0 %vm697_vm5, %v684_v33 }
 0x205   : > { %1801 = vmatprep.subr.bf16.mxu0 %v2245_v0 }
 0x207   : > { %v672_v34 = vpop.permute.xlu0 %671 }
 0x208   : > { %1793 = vmatmul.mubr.msk.f32.vlgmr.msra.gmra.mxu0 %vm697_vm5, %v672_v34 }
 0x209   : > { %1803 = vmatprep.mubr.msk.bf16.mxu0 %vm2246_vm0, %v2245_v0 }
 0x24c   : > { %v770_v39 = vpop.f32.mrf.mxu1 }
 0x24d   : > { %v2629_v40 = vsel %vm2623_vm6, %v770_v39, -1000000.0 }
 0x24e   : > { %v1773_v41 = vpop.f32.mrf.mxu1  ;;  %v1011_v42 = vsel %vm442_vm1, %v2629_v40, -inf }
 0x24f   : > { %1012 = vmax.xlane.f32.xlu1 %v1011_v42 }
 0x2bf   : > { %v846_v43 = vpop.f32.mrf.mxu0 }
 0x2c0   : > { %v2635_v44 = vsel %vm2623_vm6, %v846_v43, -1000000.0 }
 0x2c1   : > { %v1780_v45 = vpop.f32.mrf.mxu0  ;;  %v922_v46 = vpop.f32.mrf.mxu1  ;;  %v1014_v47 = vsel %vm442_vm1, %v2635_v44, -inf }
 0x2c2   : > { %v2641_v48 = vsel %vm2623_vm6, %v922_v46, -1000000.0  ;;  %1015 = vmax.xlane.f32.xlu0 %v1014_v47 }
 0x2c3   : > { %v1787_v49 = vpop.f32.mrf.mxu1  ;;  %v1017_v50 = vsel %vm442_vm1, %v2641_v48, -inf }
 0x2c6   : > { %1018 = vmax.xlane.f32.xlu0 %v1017_v50 }
 0x2c8   : > { %v998_v51 = vpop.f32.mrf.mxu0 }
 0x2c9   : > { %v2647_v52 = vsel %vm2623_vm6, %v998_v51, -1000000.0 }
 0x2ca   : > { %v1794_v53 = vpop.f32.mrf.mxu0  ;;  %v1020_v54 = vsel %vm442_vm1, %v2647_v52, -inf }
 0x2cb   : > { %1021 = vmax.xlane.f32.xlu1 %v1020_v54 }
 0x2d8   : > { %v2651_v55 = vpop.xlane.xlu1 %1012 }
 0x2d9   : > { %vm1023_vm7 = vcmp.eq.f32.partialorder %v2629_v40, %v2651_v55 }
 0x2da   : > { %v1051_v56 = vsel %vm1023_vm7, -3.4028235e+38, %v2629_v40  ;;  %v1681_v13 = vsel %vm1023_vm7, 1.0, %v2245_v0 }
 0x2db   : > { %v1055_v57 = vsel %vm442_vm1, %v1051_v56, -inf  ;;  %v1035_v15 = vsel %vm442_vm1, %v1681_v13, 0.0 }
 0x2dc   : > { %1056 = vmax.xlane.f32.xlu0 %v1055_v57 }
 0x34b   : > { %v2660_v58 = vpop.xlane.xlu0 %1015 }
 0x34c   : > { %vm1024_vm8 = vcmp.eq.f32.partialorder %v2635_v44, %v2660_v58 }
 0x34d   : > { %v1052_v59 = vsel %vm1024_vm8, -3.4028235e+38, %v2635_v44  ;;  %v1682_v18 = vsel %vm1024_vm8, 1.0, %v2245_v0 }
 0x34e   : > { %v1058_v60 = vsel %vm442_vm1, %v1052_v59, -inf  ;;  %v1038_v20 = vsel %vm442_vm1, %v1682_v18, 0.0 }
 0x34f   : > { %v2669_v61 = vpop.xlane.xlu0 %1018  ;;  %1059 = vmax.xlane.f32.xlu1 %v1058_v60 }
 0x350   : > { %vm1025_vm9 = vcmp.eq.f32.partialorder %v2641_v48, %v2669_v61 }
 0x351   : > { %v1053_v62 = vsel %vm1025_vm9, -3.4028235e+38, %v2641_v48  ;;  %v1683_v22 = vsel %vm1025_vm9, 1.0, %v2245_v0 }
 0x352   : > { %v1061_v63 = vsel %vm442_vm1, %v1053_v62, -inf  ;;  %v1041_v24 = vsel %vm442_vm1, %v1683_v22, 0.0 }
 0x353   : > { %1062 = vmax.xlane.f32.xlu0 %v1061_v63 }
 0x354   : > { %v2678_v1 = vpop.xlane.xlu1 %1021 }
 0x355   : > { %vm1026_vm10 = vcmp.eq.f32.partialorder %v2647_v52, %v2678_v1 }
 0x356   : > { %v1054_v2 = vsel %vm1026_vm10, -3.4028235e+38, %v2647_v52  ;;  %v1684_v26 = vsel %vm1026_vm10, 1.0, %v2245_v0 }
 0x357   : > { %v1064_v3 = vsel %vm442_vm1, %v1054_v2, -inf  ;;  %v1044_v28 = vsel %vm442_vm1, %v1684_v26, 0.0 }
 0x358   : > { %1065 = vmax.xlane.f32.xlu1 %v1064_v3 }
 0x365   : > { %v2687_v4 = vpop.xlane.xlu0 %1056 }
 0x366   : > { %vm1067_vm11 = vcmp.eq.f32.partialorder %v1051_v56, %v2687_v4 }
 0x367   : > { %v1095_v5 = vsel %vm1067_vm11, -3.4028235e+38, %v1051_v56  ;;  %v1685_v19 = vsel %vm1067_vm11, 1.0, %v2245_v0 }
 0x368   : > { %v1099_v6 = vsel %vm442_vm1, %v1095_v5, -inf  ;;  %v1079_v21 = vsel %vm442_vm1, %v1685_v19, 0.0 }
 0x369   : > { %1100 = vmax.xlane.f32.xlu0 %v1099_v6 }
 0x3d8   : > { %v2693_v7 = vpop.xlane.xlu1 %1059 }
 0x3d9   : > { %vm1068_vm12 = vcmp.eq.f32.partialorder %v1052_v59, %v2693_v7 }
 0x3da   : > { %v1096_v8 = vsel %vm1068_vm12, -3.4028235e+38, %v1052_v59  ;;  %v1686_v23 = vsel %vm1068_vm12, 1.0, %v2245_v0 }
 0x3db   : > { %v1102_v9 = vsel %vm442_vm1, %v1096_v8, -inf  ;;  %v1082_v25 = vsel %vm442_vm1, %v1686_v23, 0.0 }
 0x3dc   : > { %v2699_v10 = vpop.xlane.xlu0 %1062  ;;  %1103 = vmax.xlane.f32.xlu1 %v1102_v9 }
 0x3dd   : > { %vm1069_vm13 = vcmp.eq.f32.partialorder %v1053_v62, %v2699_v10 }
 0x3de   : > { %v1097_v11 = vsel %vm1069_vm13, -3.4028235e+38, %v1053_v62  ;;  %v1687_v27 = vsel %vm1069_vm13, 1.0, %v2245_v0 }
 0x3df   : > { %v1105_v12 = vsel %vm442_vm1, %v1097_v11, -inf  ;;  %v1085_v29 = vsel %vm442_vm1, %v1687_v27, 0.0 }
 0x3e0   : > { %1106 = vmax.xlane.f32.xlu0 %v1105_v12 }
 0x3e1   : > { %v2709_v14 = vpop.xlane.xlu1 %1065 }
 0x3e2   : > { %vm1070_vm14 = vcmp.eq.f32.partialorder %v1054_v2, %v2709_v14 }
 0x3e3   : > { %v1098_v16 = vsel %vm1070_vm14, -3.4028235e+38, %v1054_v2  ;;  %v1688_v31 = vsel %vm1070_vm14, 1.0, %v2245_v0 }
 0x3e4   : > { %1036 = vadd.xlane.f32.xlu0 %v1035_v15  ;;  %v1108_v17 = vsel %vm442_vm1, %v1098_v16, -inf  ;;  %v1088_v33 = vsel %vm442_vm1, %v1688_v31, 0.0 }
 0x3e5   : > { %1109 = vmax.xlane.f32.xlu1 %v1108_v17 }
 0x3e8   : > { %1039 = vadd.xlane.f32.xlu0 %v1038_v20 }
 0x3e9   : > { %1080 = vadd.xlane.f32.xlu1 %v1079_v21 }
 0x3ec   : > { %1042 = vadd.xlane.f32.xlu0 %v1041_v24 }
 0x3ed   : > { %1083 = vadd.xlane.f32.xlu1 %v1082_v25 }
 0x3f0   : > { %1045 = vadd.xlane.f32.xlu0 %v1044_v28 }
 0x3f1   : > { %1086 = vadd.xlane.f32.xlu1 %v1085_v29 }
 0x3f2   : > { %v1101_v32 = vpop.xlane.xlu0 %1100 }
 0x3f3   : > { %vm1111_vm15 = vcmp.eq.f32.partialorder %v1095_v5, %v1101_v32 }
 0x3f4   : > { %v1689_v34 = vsel %vm1111_vm15, 1.0, %v2245_v0  ;;  %v1139_v36 = vsel %vm1111_vm15, -3.4028235e+38, %v1095_v5 }
 0x3f5   : > { %1089 = vadd.xlane.f32.xlu1 %v1088_v33  ;;  %v1123_v35 = vsel %vm442_vm1, %v1689_v34, 0.0  ;;  %v1143_v37 = vsel %vm442_vm1, %v1139_v36, -inf }
 0x3f6   : > { %1124 = vadd.xlane.f32.xlu0 %v1123_v35 }
 0x3fa   : > { %1144 = vmax.xlane.f32.xlu0 %v1143_v37 }
 0x465   : > { %v1104_v38 = vpop.xlane.xlu1 %1103 }
 0x466   : > { %vm1112_vm3 = vcmp.eq.f32.partialorder %v1096_v8, %v1104_v38 }
 0x467   : > { %v1690_v39 = vsel %vm1112_vm3, 1.0, %v2245_v0  ;;  %v1140_v43 = vsel %vm1112_vm3, -3.4028235e+38, %v1096_v8 }
 0x468   : > { %v1126_v41 = vsel %vm442_vm1, %v1690_v39, 0.0  ;;  %v1146_v47 = vsel %vm442_vm1, %v1140_v43, -inf }
 0x469   : > { %v2752_v42 = vpop.xlane.xlu0 %1106  ;;  %1127 = vadd.xlane.f32.xlu1 %v1126_v41 }
 0x46a   : > { %vm1113_vm6 = vcmp.eq.f32.partialorder %v1097_v11, %v2752_v42 }
 0x46b   : > { %v1691_v45 = vsel %vm1113_vm6, 1.0, %v2245_v0  ;;  %v1141_v50 = vsel %vm1113_vm6, -3.4028235e+38, %v1097_v11 }
 0x46c   : > { %v1129_v46 = vsel %vm442_vm1, %v1691_v45, 0.0  ;;  %v1149_v53 = vsel %vm442_vm1, %v1141_v50, -inf }
 0x46d   : > { %v1037_v49 = vpop.xlane.xlu0 %1036  ;;  %1130 = vadd.xlane.f32.xlu0 %v1129_v46  ;;  %1147 = vmax.xlane.f32.xlu1 %v1146_v47 }
 0x46e   : > { %v2758_v51 = vpop.xlane.xlu1 %1109  ;;  %vm1171_vm10 = vcmp.ge.f32.partialorder %v1037_v49, 4.0 }
 0x46f   : > { %vm1114_vm7 = vcmp.eq.f32.partialorder %v1098_v16, %v2758_v51 }
 0x470   : > { %v1692_v54 = vsel %vm1114_vm7, 1.0, %v2245_v0  ;;  %v1142_v59 = vsel %vm1114_vm7, -3.4028235e+38, %v1098_v16 }
 0x471   : > { %v1040_v56 = vpop.xlane.xlu0 %1039  ;;  %1150 = vmax.xlane.f32.xlu0 %v1149_v53  ;;  %v1132_v57 = vsel %vm442_vm1, %v1692_v54, 0.0  ;;  %v1152_v62 = vsel %vm442_vm1, %v1142_v59, -inf }
 0x472   : > { %1133 = vadd.xlane.f32.xlu1 %v1132_v57  ;;  %v1081_v63 = vpop.xlane.xlu1 %1080  ;;  %vm1172_vm14 = vcmp.ge.f32.partialorder %v1040_v56, 4.0 }
 0x473   : > { %v1091_v3 = vadd.f32 %v1081_v63, %v1037_v49 }
 0x475   : > { %v1043_v60 = vpop.xlane.xlu0 %1042  ;;  %vm1163_vm9 = vcmp.ge.f32.partialorder %v1091_v3, 4.0 }
 0x476   : > { %1153 = vmax.xlane.f32.xlu1 %v1152_v62  ;;  %v1084_v19 = vpop.xlane.xlu1 %1083  ;;  %vm1173_vm7 = vcmp.ge.f32.partialorder %v1043_v60, 4.0 }
 0x477   : > { %v1092_v22 = vadd.f32 %v1084_v19, %v1040_v56  ;;  %v1940_v19 = vld [vmem:[#allocation15] sm:$0xff]  }
 0x479   : > { %v2765_v2 = vpop.xlane.xlu0 %1045  ;;  %vm1164_vm13 = vcmp.ge.f32.partialorder %v1092_v22, 4.0 }
 0x47a   : > { %v1087_v20 = vpop.xlane.xlu1 %1086 }
 0x47b   : > { %v1093_v24 = vadd.f32 %v1087_v20, %v1043_v60 }
 0x47d   : > { %vm1165_vm6 = vcmp.ge.f32.partialorder %v1093_v24, 4.0 }
 0x47e   : > { %v1090_v21 = vpop.xlane.xlu1 %1089 }
 0x47f   : > { %v1125_v5 = vpop.xlane.xlu0 %1124 }
 0x480   : > { %v1135_v6 = vadd.f32 %v1125_v5, %v1091_v3 }
 0x482   : > { %vm1155_vm8 = vcmp.ge.f32.partialorder %v1135_v6, 4.0 }
 0x483   : > { %v1145_v8 = vpop.xlane.xlu0 %1144 }
 0x484   : > { %v1159_v9 = vsel %vm1155_vm8, %v1101_v32, %v1145_v8 }
 0x485   : > { %v1167_v11 = vsel %vm1163_vm9, %v2687_v4, %v1159_v9 }
 0x486   : > { %v1175_v12 = vsel %vm1171_vm10, %v2651_v55, %v1167_v11 }
 0x487   : > { %vm1179_vm11 = vcmp.lt.f32.partialorder %v2629_v40, %v1175_v12 }
 0x488   : > { %v1183_v13 = vsel %vm1179_vm11, -1000000.0, %v2629_v40  ;;  %vm1174_vm11 = vcmp.ge.f32.partialorder %v2765_v2, 4.0 }
 0x489   : > { %v1187_v15 = vsub.f32 %v1183_v13, %v2651_v55 }
 0x48b   : > { %v1191_v16 = vmul.f32 1.442695, %v1187_v15 }
 0x48d   : > { %1941 = vpow2.f32 %v1191_v16 }
 0x49a   : > { %v1942_v17 = vpop.eup %1941 }
 0x49b   : > { %v1199_v18 = vsel %vm442_vm1, %v1942_v17, 0.0 }
 0x49c   : > { %1200 = vadd.xlane.f32.xlu0 %v1199_v18  ;;  %v1939_v18 = vld [vmem:[#allocation15 + $0x8] sm:$0xff]  }
 0x4f2   : > { %v1128_v23 = vpop.xlane.xlu1 %1127 }
 0x4f3   : > { %v1136_v4 = vadd.f32 %v1128_v23, %v1092_v22 }
 0x4f5   : > { %vm1156_vm12 = vcmp.ge.f32.partialorder %v1136_v4, 4.0 }
 0x4f6   : > { %v1131_v25 = vpop.xlane.xlu0 %1130  ;;  %v1148_v26 = vpop.xlane.xlu1 %1147 }
 0x4f7   : > { %v1137_v40 = vadd.f32 %v1131_v25, %v1093_v24  ;;  %v1160_v27 = vsel %vm1156_vm12, %v1104_v38, %v1148_v26 }
 0x4f8   : > { %v1168_v55 = vsel %vm1164_vm13, %v2693_v7, %v1160_v27 }
 0x4f9   : > { %vm1157_vm15 = vcmp.ge.f32.partialorder %v1137_v40, 4.0  ;;  %v1176_v28 = vsel %vm1172_vm14, %v2660_v58, %v1168_v55 }
 0x4fa   : > { %vm1180_vm3 = vcmp.lt.f32.partialorder %v2635_v44, %v1176_v28  ;;  %v1151_v29 = vpop.xlane.xlu0 %1150 }
 0x4fb   : > { %v1184_v31 = vsel %vm1180_vm3, -1000000.0, %v2635_v44  ;;  %v1161_v32 = vsel %vm1157_vm15, %v2752_v42, %v1151_v29  ;;  %v1094_v42 = vadd.f32 %v1090_v21, %v2765_v2 }
 0x4fc   : > { %v1188_v33 = vsub.f32 %v1184_v31, %v2660_v58  ;;  %v1169_v34 = vsel %vm1165_vm6, %v2699_v10, %v1161_v32  ;;  %v1134_v58 = vpop.xlane.xlu1 %1133 }
 0x4fd   : > { %v1177_v35 = vsel %vm1173_vm7, %v2669_v61, %v1169_v34  ;;  %v1138_v43 = vadd.f32 %v1134_v58, %v1094_v42  ;;  %vm1166_vm10 = vcmp.ge.f32.partialorder %v1094_v42, 4.0 }
 0x4fe   : > { %v1193_v36 = vmul.f32 1.442695, %v1188_v33  ;;  %vm1181_vm8 = vcmp.lt.f32.partialorder %v2641_v48, %v1177_v35 }
 0x4ff   : > { %v1185_v7 = vsel %vm1181_vm8, -1000000.0, %v2641_v48  ;;  %vm1158_vm9 = vcmp.ge.f32.partialorder %v1138_v43, 4.0 }
 0x500   : > { %1943 = vpow2.f32 %v1193_v36  ;;  %v1189_v37 = vsub.f32 %v1185_v7, %v2669_v61  ;;  %v1154_v45 = vpop.xlane.xlu1 %1153 }
 0x501   : > { %v1162_v48 = vsel %vm1158_vm9, %v2758_v51, %v1154_v45 }
 0x502   : > { %v1195_v38 = vmul.f32 1.442695, %v1189_v37  ;;  %v1170_v61 = vsel %vm1166_vm10, %v2709_v14, %v1162_v48 }
 0x503   : > { %v1178_v46 = vsel %vm1174_vm11, %v2678_v1, %v1170_v61 }
 0x504   : > { %1945 = vpow2.f32 %v1195_v38  ;;  %vm1182_vm12 = vcmp.lt.f32.partialorder %v2647_v52, %v1178_v46 }
 0x505   : > { %v1186_v49 = vsel %vm1182_vm12, -1000000.0, %v2647_v52 }
 0x506   : > { %v1190_v50 = vsub.f32 %v1186_v49, %v2678_v1 }
 0x508   : > { %v1197_v51 = vmul.f32 1.442695, %v1190_v50 }
 0x50d   : > { %v1944_v44 = vpop.eup %1943 }
 0x50e   : > { %v1202_v39 = vsel %vm442_vm1, %v1944_v44, 0.0 }
 0x50f   : > { %1203 = vadd.xlane.f32.xlu1 %v1202_v39 }
 0x511   : > { %v1946_v41 = vpop.eup %1945 }
 0x512   : > { %v1205_v10 = vsel %vm442_vm1, %v1946_v41, 0.0 }
 0x513   : > { %1206 = vadd.xlane.f32.xlu0 %v1205_v10 }
 0x520   : > { %691 = vrot.lane.b32.xlu1 %v2604_v30, %s2248_s12 }
 0x525   : > { %v1201_v47 = vpop.xlane.xlu0 %1200 }
 0x526   : > { %1947 = vrcp.f32 %v1201_v47 }
 0x527   : > { %1949 = vpow2.f32 %v1197_v51 }
 0x529   : > { %688 = vrot.lane.b32.xlu0 %v2604_v30, %s2247_s13 }
 0x533   : > { %v1948_v14 = vpop.eup %1947 }
 0x534   : > { %v1215_v53 = vmul.f32 %v1948_v14, %v1942_v17  ;;  %v1950_v56 = vpop.eup %1949 }
 0x535   : > { %v1208_v57 = vsel %vm442_vm1, %v1950_v56, 0.0 }
 0x536   : > { %v1219_v54 = vpack.c.bf16 %v1215_v53, %v1215_v53 }
 0x538   : > { %1798 = vmatmul.mubr.msk.bf16.vlgmr.msra.gmra.mxu1 %vm442_vm1, %v1219_v54 }
 0x539   : > { %1809 = vmatprep.mubr.msk.bf16.mxu1 %vm2246_vm0, %v2245_v0 }
 0x544   : > { %1209 = vadd.xlane.f32.xlu1 %v1208_v57 }
 0x555   : > { %694 = vrot.lane.b32.xlu1 %v2604_v30, %s2249_s25 }
 0x598   : > { %v1204_v52 = vpop.xlane.xlu1 %1203 }
 0x599   : > { %1951 = vrcp.f32 %v1204_v52 }
 0x59c   : > { %v1207_v1 = vpop.xlane.xlu0 %1206  ;;  %v692_v59 = vpop.permute.xlu1 %691 }
 0x59d   : > { %1953 = vrcp.f32 %v1207_v1  ;;  %1808 = vmatpush3.bf16.msra.mxu1 %v692_v59 }
 0x59e   : > { %1819 = vmatprep.subr.bf16.mxu1 %v2245_v0 }
 0x5a0   : > { %v689_v60 = vpop.permute.xlu0 %688 }
 0x5a1   : > { %1802 = vmatpush3.bf16.msra.mxu0 %v689_v60 }
 0x5a2   : > { %1813 = vmatprep.subr.bf16.mxu0 %v2245_v0 }
 0x5a6   : > { %v1952_v62 = vpop.eup %1951 }
 0x5a7   : > { %v1216_v63 = vmul.f32 %v1952_v62, %v1944_v44 }
 0x5a9   : > { %v1220_v2 = vpack.c.bf16 %v1216_v63, %v1216_v63 }
 0x5aa   : > { %v1954_v3 = vpop.eup %1953 }
 0x5ab   : > { %1804 = vmatmul.mubr.msk.bf16.vlgmr.msra.gmra.mxu0 %vm442_vm1, %v1220_v2  ;;  %v1217_v5 = vmul.f32 %v1954_v3, %v1946_v41 }
 0x5ac   : > { %1815 = vmatprep.mubr.msk.bf16.mxu0 %vm2246_vm0, %v2245_v0 }
 0x5ad   : > { %v1221_v30 = vpack.c.bf16 %v1217_v5, %v1217_v5 }
 0x5af   : > { %1810 = vmatmul.mubr.msk.bf16.vlgmr.msra.gmra.mxu1 %vm442_vm1, %v1221_v30 }
 0x5b0   : > { %1823 = vmatprep.mubr.msk.bf16.mxu1 %vm2246_vm0, %v2245_v0  ;;  %1820 = vmatpush3.bf16.msra.mxu1 %v1939_v18 }
 0x5b1   : > { %1821 = vmatprep.subr.bf16.mxu1 %v2245_v0 }
 0x5b4   : > { %1822 = vmatpush3.bf16.msra.mxu1 %v1940_v19 }
 0x5cd   : > { %v1210_v6 = vpop.xlane.xlu1 %1209 }
 0x5ce   : > { %1955 = vrcp.f32 %v1210_v6 }
 0x5d1   : > { %v695_v8 = vpop.permute.xlu1 %694 }
 0x5d2   : > { %1814 = vmatpush3.bf16.msra.mxu0 %v695_v8 }
 0x5db   : > { %v1956_v9 = vpop.eup %1955 }
 0x5dc   : > { %v1218_v11 = vmul.f32 %v1956_v9, %v1950_v56 }
 0x5de   : > { %v1222_v12 = vpack.c.bf16 %v1218_v11, %v1218_v11 }
 0x5e0   : > { %1816 = vmatmul.mubr.msk.bf16.vlgmr.msra.gmra.mxu0 %vm442_vm1, %v1222_v12 }
 0x5f8   : > { %v1260_v13 = vpop.f32.mrf.mxu1 }
 0x5f9   : > { %v1395_v33 = vpack.c.bf16 %v1260_v13, %v1260_v13 }
 0x5fa   : > { %v1799_v15 = vpop.f32.mrf.mxu1 }
 0x5fc   : > { %v1263_v16 = vpop.f32.mrf.mxu1 }
 0x5fe   : > { %v1800_v17 = vpop.f32.mrf.mxu1 }
 0x66b   : > { %v1303_v20 = vpop.f32.mrf.mxu0 }
 0x66c   : > { %v1396_v21 = vpack.c.bf16 %v1303_v20, %v1303_v20 }
 0x66d   : > { %v1805_v22 = vpop.f32.mrf.mxu0 }
 0x66e   : > { %1400 = vrot.lane.b32.xlu0 %v1396_v21, %s2250_s27 }
 0x66f   : > { %v1306_v23 = vpop.f32.mrf.mxu0  ;;  %v1346_v4 = vpop.f32.mrf.mxu1 }
 0x670   : > { %v1397_v24 = vpack.c.bf16 %v1346_v4, %v1346_v4 }
 0x671   : > { %v1806_v25 = vpop.f32.mrf.mxu0  ;;  %v1811_v26 = vpop.f32.mrf.mxu1 }
 0x672   : > { %1403 = vrot.lane.b32.xlu1 %v1397_v24, %s2251_s8 }
 0x673   : > { %v1349_v40 = vpop.f32.mrf.mxu1 }
 0x675   : > { %v1812_v27 = vpop.f32.mrf.mxu1 }
 0x6a0   : > { %v1389_v55 = vpop.f32.mrf.mxu0 }
 0x6a1   : > { %v1398_v28 = vpack.c.bf16 %v1389_v55, %v1389_v55 }
 0x6a2   : > { %v1817_v0 = vpop.f32.mrf.mxu0 }
 0x6a3   : > { %1406 = vrot.lane.b32.xlu0 %v1398_v28, %s2252_s4 }
 0x6a4   : > { %v1392_v29 = vpop.f32.mrf.mxu0 }
 0x6a6   : > { %v1818_v31 = vpop.f32.mrf.mxu0 }
 0x6e0   : > { %v1401_v32 = vpop.permute.xlu0 %1400 }
 0x6e1   : > { %v1410_v35 = vsel %vm697_vm5, %v1395_v33, %v1401_v32 }
 0x6e4   : > { %v1404_v34 = vpop.permute.xlu1 %1403 }
 0x6e5   : > { %v1412_v36 = vsel %vm442_vm1, %v1410_v35, %v1404_v34 }
 0x715   : > { %v1407_v7 = vpop.permute.xlu0 %1406 }
 0x716   : > { %v1414_v37 = vsel %vm616_vm4, %v1412_v36, %v1407_v7 }
 0x717   : > { %1824 = vmatmul.mubr.msk.bf16.vlgmr.msra.gmra.mxu1 %vm521_vm2, %v1414_v37 }
 0x7d7   : > { %v1467_v38 = vpop.f32.mrf.mxu1 }
 0x7d8   : > { %1473 = vst.msk [vmem:[%s433_s28] sm:$0xff] %vm521_vm2, %v1467_v38 }
 0x7d9   : > { %v1825_v44 = vpop.f32.mrf.mxu1 }
 0x7da   : > { %2166 = shalt.err (!%p2163_p4)
}
 0x7db   : > { %s2167_s6 = scalar_lea.hbm %s2824_s2, 128  ;;  %s2171_s21 = scalar_lea.hbm %s2934_s14, 256 }
 0x7dc   : > { %p2168_p13 = scmp.ne.s32.totalorder %s2824_s2, %s2167_s6  ;;  %p2172_p2 = scmp.lt.s32.totalorder %s2824_s2, %s2934_s14 }
 0x7dd   : > { %p2173_p0 = scmp.lt.s32.totalorder %s2171_s21, %s2167_s6 }
 0x7de   : > { %p2169_p7 = pnand %p2168_p13, %p2935_p8 }
 0x7df   : > { %p2174_p1 = por %p2173_p0, %p2172_p2 }
 0x7e0   : > { %p2170_p9 = pneg %p2169_p7 }
 0x7e2   : > { %p2175_p6 = pnand %p2174_p1, %p2170_p9 }
 0x7e4   : > { %2178 = shalt.err (!%p2175_p6)
}
 0x7e5   : > { %1849 = dma.vmem_to_hbm [thread:$0]  (%p2935_p8), %s2826_s23, 128, %s2824_s2, %s1475_s22   ;;  %v1470_v39 = vpop.f32.mrf.mxu1 }
 0x7e7   : > { %v1826_v41 = vpop.f32.mrf.mxu1 }
 0x7e8 PF: > { %s2936_s13 = sld [smem:[#allocation23_spill]]  ;;  %p2939_p12 = scmp.ge.s32.totalorder %s2231_s11, 2 }
 0x7e9   : > { %s2937_s12 = sld [smem:[#allocation25_spill]] }
 0x7ee   : > { %s1500_s25 = sand.u32 1, %s2936_s13  }
 0x7ef   : > { %p2938_p11 = scmp.ne.s32.totalorder %s2937_s12, 0  ;;  %s1501_s20 = scalar_lea.sflag [#allocation6], %s1500_s25 }
 0x7f1   : > { %p1875_p3 = pnand %p2939_p12, %p2938_p11 }
 0x7f3   : > { %p1876_p5 = pneg %p1875_p3 }
 0x7f5   : > { %2214 = dma.done.wait (%p1876_p5), %s1501_s20, 128  }
 0x7f6   : > { %2216 = vsyncadd (%p1876_p5), %s1501_s20, 4294967168  ;;  %s2940_s11 = sld [smem:[#allocation26_spill]]  ;;  %s2943_s30 = smov %s2223_s9 }
 0x7f7   : > { %s2941_s24 = sld [smem:[#allocation24_spill]] }
 0x7f8   : > { %s2942_s10 = sld [smem:[#allocation27_spill]] }
 0x7fc   : > { %p30_p8 = scmp.ge.s32.totalorder %s2940_s11, 4  }
 0x7fd   : > { %s2944_s9 = smov %s2941_s24 }
 0x7fe   :  { %32 = sbr.rel (!%p30_p8) target bundleno = 19 (0x13), region = 133 }
 0x803   :  { %1506 = vsyncpa [#allocation5], 1 }
 0x804   :  { %1508 = vsyncpa [#allocation5 + $0x1], 1 }
 0x805   :  { %1509 = vsyncpa [#allocation8], 1 }
 0x806   :  { %1511 = vsyncpa [#allocation8 + $0x1], 1 }
 0x807   :  { %1512 = vsyncpa [#allocation11], 1 }
 0x808   :  { %1513 = vsyncpa [#allocation14], 1 }
 0x809   :  { %1514 = vsyncpa [#allocation6], 1 }
 0x80a   :  { %1516 = vsyncpa [#allocation6 + $0x1], 1 }

</bundles_post_ra>
